<compile_context>
chip_gen: v7x
topology: tpu7x:2x2x1
jax: 0.10.0
libtpu: 0.0.40
codegen_flags: <defaults>
</compile_context>

<pallas_src>
import functools
import math

import jax
import jax.numpy as jnp
import numpy as np
from jax.experimental import pallas as pl
from jax.experimental.pallas import tpu as pltpu


_VMEM_LIMIT = 64 * 1024 * 1024   # stay inside v7x's 64 MiB physical VMEM


def _fit_tile(dim, desired, quantum):
    """Largest tile <= desired that divides `dim` and is a multiple of
    `quantum`; falls back to the full dim (block == full array dim is always
    legal w.r.t. the (8,128) tiling rule)."""
    if dim <= desired:
        return dim
    t = (desired // quantum) * quantum
    while t >= quantum:
        if dim % t == 0:
            return t
        t -= quantum
    return dim


# --------------------------- fused QKV projection ---------------------------

def _qkv_proj_kernel(x_ref, w_ref, o_ref, acc_ref):
    @pl.when(pl.program_id(3) == 0)
    def _init():
        acc_ref[...] = jnp.zeros_like(acc_ref)

    acc_ref[...] += jnp.dot(x_ref[...], w_ref[...],
                            preferred_element_type=jnp.float32)

    @pl.when(pl.program_id(3) == pl.num_programs(3) - 1)
    def _finalize():
        o_ref[...] = acc_ref[...].astype(o_ref.dtype)


def fused_qkv_projection(x, w_qkv):
    """x: [M, K] bf16, w_qkv: [3, nh, K, hd] bf16 -> [3, nh, M, hd] bf16."""
    M, K = x.shape
    _, nh, _, hd = w_qkv.shape
    tm = _fit_tile(M, 256, 8)
    tk = _fit_tile(K, 512, 128)
    grid = (3, nh, M // tm, K // tk)
    return pl.pallas_call(
        _qkv_proj_kernel,
        out_shape=jax.ShapeDtypeStruct((3, nh, M, hd), jnp.bfloat16),
        grid=grid,
        in_specs=[
            pl.BlockSpec((tm, tk), lambda p, h, i, k: (i, k)),
            pl.BlockSpec((None, None, tk, hd), lambda p, h, i, k: (p, h, k, 0)),
        ],
        out_specs=pl.BlockSpec((None, None, tm, hd),
                               lambda p, h, i, k: (p, h, i, 0)),
        scratch_shapes=[pltpu.VMEM((tm, hd), jnp.float32)],
        compiler_params=pltpu.CompilerParams(
            dimension_semantics=("parallel", "parallel", "parallel",
                                 "arbitrary"),
            vmem_limit_bytes=_VMEM_LIMIT),
    )(x, w_qkv)


# ------------------- flash attention (RoPE + online softmax) ----------------

def _flash_attn_kernel(q_ref, k_ref, v_ref, cq_ref, sq_ref, ck_ref, sk_ref,
                       o_ref, m_sc, l_sc, acc_sc, *, half):
    ki = pl.program_id(2)

    @pl.when(ki == 0)
    def _init():
        m_sc[...] = jnp.full(m_sc.shape, -jnp.inf, dtype=m_sc.dtype)
        l_sc[...] = jnp.zeros(l_sc.shape, dtype=l_sc.dtype)
        acc_sc[...] = jnp.zeros(acc_sc.shape, dtype=acc_sc.dtype)

    q = q_ref[...].astype(jnp.float32)     # (nh, tq, hd)
    k = k_ref[...].astype(jnp.float32)     # (nh, tk, hd)
    v = v_ref[...]                         # (nh, tk, hd) bf16 MXU operand

    def rope(x, c, s):
        # rotate_half via static half-slices; RoPE math kept in f32.
        x1 = x[..., :half]
        x2 = x[..., half:]
        rot = jnp.concatenate([-x2, x1], axis=-1)
        return x * c + rot * s

    # softmax scale is pre-folded into cq/sq -> no O(S^2) scaling later.
    qr = rope(q, cq_ref[...], sq_ref[...]).astype(jnp.bfloat16)
    kr = rope(k, ck_ref[...], sk_ref[...]).astype(jnp.bfloat16)

    # batched over heads, contracting hd (no explicit transpose of k)
    s = jnp.einsum('hqd,hkd->hqk', qr, kr,
                   preferred_element_type=jnp.float32)      # (nh, tq, tk)

    m_prev = m_sc[...]
    m_new = jnp.maximum(m_prev, s.max(axis=-1, keepdims=True))
    alpha = jnp.exp(m_prev - m_new)
    p = jnp.exp(s - m_new)
    l_sc[...] = alpha * l_sc[...] + p.sum(axis=-1, keepdims=True)
    acc_sc[...] = alpha * acc_sc[...] + jnp.einsum(
        'hqk,hkd->hqd', p.astype(v.dtype), v,
        preferred_element_type=jnp.float32)
    m_sc[...] = m_new

    # TODO(synk): training-mode attention dropout not implemented (eval identity).
    @pl.when(ki == pl.num_programs(2) - 1)
    def _finalize():
        inv_l = pl.reciprocal(l_sc[...], approx=True)
        o_ref[...] = (acc_sc[...] * inv_l).astype(o_ref.dtype)


def flash_attention(qkv, cos_q, sin_q, cos_k, sin_k):
    """qkv: [3, nh, B, S, hd] bf16; cos/sin: [B, S, hd] f32
    -> [nh, B, S, hd] bf16 (head-major, no transpose needed afterwards)."""
    _, nh, B, S, hd = qkv.shape
    tq = _fit_tile(S, 128, 8)
    tk = _fit_tile(S, 128, 8)
    grid = (B, S // tq, S // tk)
    kernel = functools.partial(_flash_attn_kernel, half=hd // 2)
    return pl.pallas_call(
        kernel,
        out_shape=jax.ShapeDtypeStruct((nh, B, S, hd), jnp.bfloat16),
        grid=grid,
        in_specs=[
            pl.BlockSpec((None, nh, None, tq, hd),
                         lambda b, qi, ki: (0, 0, b, qi, 0)),   # q
            pl.BlockSpec((None, nh, None, tk, hd),
                         lambda b, qi, ki: (1, 0, b, ki, 0)),   # k
            pl.BlockSpec((None, nh, None, tk, hd),
                         lambda b, qi, ki: (2, 0, b, ki, 0)),   # v
            pl.BlockSpec((None, tq, hd), lambda b, qi, ki: (b, qi, 0)),  # cos*scale
            pl.BlockSpec((None, tq, hd), lambda b, qi, ki: (b, qi, 0)),  # sin*scale
            pl.BlockSpec((None, tk, hd), lambda b, qi, ki: (b, ki, 0)),  # cos
            pl.BlockSpec((None, tk, hd), lambda b, qi, ki: (b, ki, 0)),  # sin
        ],
        out_specs=pl.BlockSpec((nh, None, tq, hd),
                               lambda b, qi, ki: (0, b, qi, 0)),
        scratch_shapes=[
            pltpu.VMEM((nh, tq, 1), jnp.float32),    # running max
            pltpu.VMEM((nh, tq, 1), jnp.float32),    # running denom
            pltpu.VMEM((nh, tq, hd), jnp.float32),   # output accumulator
        ],
        compiler_params=pltpu.CompilerParams(
            dimension_semantics=("parallel", "parallel", "arbitrary"),
            vmem_limit_bytes=_VMEM_LIMIT),
    )(qkv, qkv, qkv, cos_q, sin_q, cos_k, sin_k)


# ------------------------------ output projection ---------------------------

def _out_proj_kernel(a_ref, w_ref, o_ref, acc_ref):
    @pl.when(pl.program_id(2) == 0)
    def _init():
        acc_ref[...] = jnp.zeros_like(acc_ref)

    acc_ref[...] += jnp.dot(a_ref[...], w_ref[...],
                            preferred_element_type=jnp.float32)

    @pl.when(pl.program_id(2) == pl.num_programs(2) - 1)
    def _finalize():
        o_ref[...] = acc_ref[...].astype(o_ref.dtype)


def out_projection(attn, w_o):
    """attn: [nh, M, hd] bf16, w_o: [nh, hd, H] bf16 -> [M, H] f32.
    The (head, hd) contraction is the innermost grid axis, so the head-major
    attention output is consumed directly (no HBM transpose)."""
    nh, M, hd = attn.shape
    _, _, H = w_o.shape
    tm = _fit_tile(M, 256, 8)
    tn = _fit_tile(H, 256, 128)
    grid = (M // tm, H // tn, nh)
    return pl.pallas_call(
        _out_proj_kernel,
        out_shape=jax.ShapeDtypeStruct((M, H), jnp.float32),
        grid=grid,
        in_specs=[
            pl.BlockSpec((None, tm, hd), lambda i, j, h: (h, i, 0)),
            pl.BlockSpec((None, hd, tn), lambda i, j, h: (h, 0, j)),
        ],
        out_specs=pl.BlockSpec((tm, tn), lambda i, j, h: (i, j)),
        scratch_shapes=[pltpu.VMEM((tm, tn), jnp.float32)],
        compiler_params=pltpu.CompilerParams(
            dimension_semantics=("parallel", "parallel", "arbitrary"),
            vmem_limit_bytes=_VMEM_LIMIT),
    )(attn, w_o)


# ------------------------------ glue / params -------------------------------

def rotary_cos_sin(seq_len, dim, base=10000.0):
    inv_freq = 1.0 / (base ** (jnp.arange(0, dim, 2, dtype=jnp.float32) / dim))
    t = jnp.arange(seq_len, dtype=jnp.float32)
    freqs = jnp.einsum('i,j->ij', t, inv_freq)
    emb = jnp.concatenate([freqs, freqs], axis=-1)
    return jnp.cos(emb), jnp.sin(emb)               # each [seq_len, dim]


def init_params(key, hidden_size):
    # nn.Linear default init U(-1/sqrt(in), 1/sqrt(in)); weights are stored
    # pre-transposed as (in, out) so no .T is materialized at call time.
    ks = jax.random.split(key, 4)
    bound = 1.0 / math.sqrt(hidden_size)
    mk = lambda k: jax.random.uniform(k, (hidden_size, hidden_size),
                                      minval=-bound, maxval=bound,
                                      dtype=jnp.float32)
    return dict(q=mk(ks[0]), k=mk(ks[1]), v=mk(ks[2]), o=mk(ks[3]))


def prepare_params(params, num_heads):
    """One-time weight repack: stack q/k/v, split by head, cast to bf16."""
    H = params['q'].shape[0]
    hd = H // num_heads
    w_qkv = jnp.stack([params['q'], params['k'], params['v']])        # (3, H, H)
    w_qkv = w_qkv.reshape(3, H, num_heads, hd).transpose(0, 2, 1, 3)  # (3, nh, H, hd)
    w_o = params['o'].reshape(num_heads, hd, H)                       # (nh, hd, H)
    return dict(w_qkv=w_qkv.astype(jnp.bfloat16),
                w_o=w_o.astype(jnp.bfloat16))


def optimized_mha_forward(prep, hidden_states, position_ids, num_heads):
    """Returns (attn_output, attn_weights=None, present_key_value=None)."""
    B, S, H = hidden_states.shape
    hd = H // num_heads
    scale = hd ** -0.5

    # bf16 MXU operands, f32 accumulation inside the kernels.
    x2d = hidden_states.reshape(B * S, H).astype(jnp.bfloat16)

    qkv = fused_qkv_projection(x2d, prep['w_qkv'])        # (3, nh, B*S, hd)
    qkv = qkv.reshape(3, num_heads, B, S, hd)             # free split of M

    cos_c, sin_c = rotary_cos_sin(S, hd)
    cos = cos_c[position_ids]                             # (B, S, hd) f32
    sin = sin_c[position_ids]
    # fold the softmax scale into the q-side rotary tables.
    attn = flash_attention(qkv, cos * scale, sin * scale, cos, sin)

    attn = attn.reshape(num_heads, B * S, hd)             # (nh, M, hd), no transpose
    out = out_projection(attn, prep['w_o'])               # (M, H) f32
    out = out.reshape(B, S, H).astype(hidden_states.dtype)
    return out, None, None


# ------------------------------ reference -----------------------------------

def _reference_forward(params, hidden_states, position_ids, num_heads):
    B, S, H = hidden_states.shape
    hd = H // num_heads
    scale = hd ** -0.5
    q = hidden_states @ params['q']      # weights stored (in, out) == W.T
    k = hidden_states @ params['k']
    v = hidden_states @ params['v']
    rs = lambda t: t.reshape(B, S, num_heads, hd).transpose(0, 2, 1, 3)
    q, k, v = rs(q), rs(k), rs(v)
    cos_c, sin_c = rotary_cos_sin(S, hd)
    cos = cos_c[position_ids][:, None]      # [B, 1, S, hd]
    sin = sin_c[position_ids][:, None]
    rot = lambda x: jnp.concatenate([-x[..., hd // 2:], x[..., :hd // 2]], -1)
    q = q * cos + rot(q) * sin
    k = k * cos + rot(k) * sin
    s = jnp.einsum('bhqd,bhkd->bhqk', q, k) * scale
    p = jax.nn.softmax(s.astype(jnp.float32), axis=-1)
    o = jnp.einsum('bhqk,bhkd->bhqd', p, v)
    o = o.transpose(0, 2, 1, 3).reshape(B, S, H)
    return o @ params['o']


# --------------------------------- main --------------------------------------

if __name__ == "__main__":
    B, S, H, NH = 2, 8, 32, 4        # batch, seq, hidden, heads (head_dim = 8)

    key = jax.random.PRNGKey(0)
    k_x, k_w = jax.random.split(key)
    hidden_states = jax.random.normal(k_x, (B, S, H), dtype=jnp.float32)
    position_ids = jnp.broadcast_to(jnp.arange(S, dtype=jnp.int32), (B, S))
    params = init_params(k_w, H)
    prep = prepare_params(params, NH)

    fwd = jax.jit(functools.partial(optimized_mha_forward, num_heads=NH))
    out, attn_w, present = fwd(prep, hidden_states, position_ids)
    out = jax.block_until_ready(out)

    ref = _reference_forward(params, hidden_states, position_ids, NH)
    # bf16 MXU operands + approx reciprocal vs. an f32 reference.
    np.testing.assert_allclose(np.asarray(out), np.asarray(ref),
                               rtol=2e-2, atol=2e-2)
    print("KERNEL_OK")
</pallas_src>

<mosaic_0001>
module attributes {stable_mosaic.version = 11 : i64} {
  func.func @_qkv_proj_kernel(%arg0: i32, %arg1: i32, %arg2: i32, %arg3: i32, %arg4: memref<16x32xbf16, #tpu.memory_space<vmem>>, %arg5: memref<1x1x32x8xbf16, #tpu.memory_space<vmem>>, %arg6: memref<1x1x16x8xbf16, #tpu.memory_space<vmem>>, %arg7: memref<16x8xf32, #tpu.memory_space<vmem>>) attributes {dimension_semantics = [#tpu.dimension_semantics<parallel>, #tpu.dimension_semantics<parallel>, #tpu.dimension_semantics<parallel>, #tpu.dimension_semantics<arbitrary>], iteration_bounds = array<i64: 3, 4, 1, 1>, scalar_prefetch = 0 : i64, scratch_operands = 1 : i64, tpu.core_type = #tpu.core_type<tc>, window_params = [{transform_indices = @transform_0, window_bounds = array<i64: 16, 32>}, {transform_indices = @transform_1, window_bounds = array<i64: 1, 1, 32, 8>}, {transform_indices = @transform_2, window_bounds = array<i64: 1, 1, 16, 8>}]} {
    %c0_i32 = arith.constant 0 : i32
    %0 = arith.cmpi eq, %arg3, %c0_i32 : i32
    %1 = arith.extui %0 : i1 to i32
    %c0_i32_0 = arith.constant 0 : i32
    %2 = arith.cmpi ne, %1, %c0_i32_0 : i32
    scf.if %2 {
      %cst_12 = arith.constant 0.000000e+00 : f32
      %13 = vector.broadcast %cst_12 : f32 to vector<16x8xf32>
      %c0_13 = arith.constant 0 : index
      %c0_14 = arith.constant 0 : index
      %14 = vector.load %arg7[%c0_13, %c0_14] : memref<16x8xf32, #tpu.memory_space<vmem>>, vector<16x8xf32>
      tpu.vector_store %arg7[%c0_13, %c0_14], %13 {strides = array<i32>} : memref<16x8xf32, #tpu.memory_space<vmem>>, vector<16x8xf32>,
    } else {
    }
    %c0 = arith.constant 0 : index
    %c0_1 = arith.constant 0 : index
    %3 = vector.load %arg7[%c0, %c0_1] : memref<16x8xf32, #tpu.memory_space<vmem>>, vector<16x8xf32>
    %c0_2 = arith.constant 0 : index
    %c0_3 = arith.constant 0 : index
    %4 = vector.load %arg4[%c0_2, %c0_3] : memref<16x32xbf16, #tpu.memory_space<vmem>>, vector<16x32xbf16>
    %c0_4 = arith.constant 0 : index
    %c0_5 = arith.constant 0 : index
    %c0_6 = arith.constant 0 : index
    %c0_7 = arith.constant 0 : index
    %5 = vector.load %arg5[%c0_4, %c0_5, %c0_6, %c0_7] : memref<1x1x32x8xbf16, #tpu.memory_space<vmem>>, vector<1x1x32x8xbf16>
    %6 = vector.shape_cast %5 : vector<1x1x32x8xbf16> to vector<32x8xbf16>
    %cst = arith.constant dense<0.000000e+00> : vector<16x8xf32>
    %7 = tpu.matmul %4, %6, %cst {dimension_numbers = #tpu.dot_dimension_numbers<[1], [0], [0], [1], [0, 0, 1, 1], [], []>} : vector<16x32xbf16>, vector<32x8xbf16>, vector<16x8xf32> -> vector<16x8xf32>
    %8 = arith.addf %3, %7 : vector<16x8xf32>
    %c0_8 = arith.constant 0 : index
    %c0_9 = arith.constant 0 : index
    %9 = vector.load %arg7[%c0_8, %c0_9] : memref<16x8xf32, #tpu.memory_space<vmem>>, vector<16x8xf32>
    tpu.vector_store %arg7[%c0_8, %c0_9], %8 {strides = array<i32>} : memref<16x8xf32, #tpu.memory_space<vmem>>, vector<16x8xf32>,
    %c0_i32_10 = arith.constant 0 : i32
    %10 = arith.cmpi eq, %arg3, %c0_i32_10 : i32
    %11 = arith.extui %10 : i1 to i32
    %c0_i32_11 = arith.constant 0 : i32
    %12 = arith.cmpi ne, %11, %c0_i32_11 : i32
    scf.if %12 {
      %c0_12 = arith.constant 0 : index
      %c0_13 = arith.constant 0 : index
      %13 = vector.load %arg7[%c0_12, %c0_13] : memref<16x8xf32, #tpu.memory_space<vmem>>, vector<16x8xf32>
      %14 = arith.truncf %13 : vector<16x8xf32> to vector<16x8xbf16>
      %c0_14 = arith.constant 0 : index
      %c0_15 = arith.constant 0 : index
      %c0_16 = arith.constant 0 : index
      %c0_17 = arith.constant 0 : index
      %15 = vector.load %arg6[%c0_14, %c0_15, %c0_16, %c0_17] : memref<1x1x16x8xbf16, #tpu.memory_space<vmem>>, vector<1x1x16x8xbf16>
      %16 = vector.shape_cast %15 : vector<1x1x16x8xbf16> to vector<16x8xbf16>
      %17 = vector.shape_cast %14 : vector<16x8xbf16> to vector<1x1x16x8xbf16>
      tpu.vector_store %arg6[%c0_14, %c0_15, %c0_16, %c0_17], %17 {strides = array<i32>} : memref<1x1x16x8xbf16, #tpu.memory_space<vmem>>, vector<1x1x16x8xbf16>,
    } else {
    }
    return
  }
  func.func @transform_0(%arg0: i32, %arg1: i32, %arg2: i32, %arg3: i32) -> (i32, i32) {
    %c0_i32 = arith.constant 0 : i32
    return %arg2, %arg3 : i32, i32
  }
  func.func @transform_1(%arg0: i32, %arg1: i32, %arg2: i32, %arg3: i32) -> (i32, i32, i32, i32) {
    %c0_i32 = arith.constant 0 : i32
    %c0_i32_0 = arith.constant 0 : i32
    return %arg0, %arg1, %arg3, %c0_i32 : i32, i32, i32, i32
  }
  func.func @transform_2(%arg0: i32, %arg1: i32, %arg2: i32, %arg3: i32) -> (i32, i32, i32, i32) {
    %c0_i32 = arith.constant 0 : i32
    %c0_i32_0 = arith.constant 0 : i32
    return %arg0, %arg1, %arg2, %c0_i32 : i32, i32, i32, i32
  }
}

module attributes {stable_mosaic.version = 11 : i64} {
  func.func @_flash_attn_kernel(%arg0: i32, %arg1: i32, %arg2: i32, %arg3: memref<1x4x1x8x8xbf16, #tpu.memory_space<vmem>>, %arg4: memref<1x4x1x8x8xbf16, #tpu.memory_space<vmem>>, %arg5: memref<1x4x1x8x8xbf16, #tpu.memory_space<vmem>>, %arg6: memref<1x8x8xf32, #tpu.memory_space<vmem>>, %arg7: memref<1x8x8xf32, #tpu.memory_space<vmem>>, %arg8: memref<1x8x8xf32, #tpu.memory_space<vmem>>, %arg9: memref<1x8x8xf32, #tpu.memory_space<vmem>>, %arg10: memref<4x1x8x8xbf16, #tpu.memory_space<vmem>>, %arg11: memref<4x8x1xf32, #tpu.memory_space<vmem>>, %arg12: memref<4x8x1xf32, #tpu.memory_space<vmem>>, %arg13: memref<4x8x8xf32, #tpu.memory_space<vmem>>) attributes {dimension_semantics = [#tpu.dimension_semantics<parallel>, #tpu.dimension_semantics<parallel>, #tpu.dimension_semantics<arbitrary>], iteration_bounds = array<i64: 2, 1, 1>, scalar_prefetch = 0 : i64, scratch_operands = 3 : i64, tpu.core_type = #tpu.core_type<tc>, window_params = [{transform_indices = @transform_0, window_bounds = array<i64: 1, 4, 1, 8, 8>}, {transform_indices = @transform_1, window_bounds = array<i64: 1, 4, 1, 8, 8>}, {transform_indices = @transform_2, window_bounds = array<i64: 1, 4, 1, 8, 8>}, {transform_indices = @transform_3, window_bounds = array<i64: 1, 8, 8>}, {transform_indices = @transform_4, window_bounds = array<i64: 1, 8, 8>}, {transform_indices = @transform_5, window_bounds = array<i64: 1, 8, 8>}, {transform_indices = @transform_6, window_bounds = array<i64: 1, 8, 8>}, {transform_indices = @transform_7, window_bounds = array<i64: 4, 1, 8, 8>}]} {
    %c0_i32 = arith.constant 0 : i32
    %0 = arith.cmpi eq, %arg2, %c0_i32 : i32
    %1 = arith.extui %0 : i1 to i32
    %c0_i32_0 = arith.constant 0 : i32
    %2 = arith.cmpi ne, %1, %c0_i32_0 : i32
    scf.if %2 {
      %cst_52 = arith.constant 0xFF800000 : f32
      %72 = vector.broadcast %cst_52 : f32 to vector<4x8x1xf32>
      %c0_53 = arith.constant 0 : index
      %c0_54 = arith.constant 0 : index
      %c0_55 = arith.constant 0 : index
      %73 = vector.load %arg11[%c0_53, %c0_54, %c0_55] : memref<4x8x1xf32, #tpu.memory_space<vmem>>, vector<4x8x1xf32>
      tpu.vector_store %arg11[%c0_53, %c0_54, %c0_55], %72 {strides = array<i32>} : memref<4x8x1xf32, #tpu.memory_space<vmem>>, vector<4x8x1xf32>,
      %cst_56 = arith.constant 0.000000e+00 : f32
      %74 = vector.broadcast %cst_56 : f32 to vector<4x8x1xf32>
      %c0_57 = arith.constant 0 : index
      %c0_58 = arith.constant 0 : index
      %c0_59 = arith.constant 0 : index
      %75 = vector.load %arg12[%c0_57, %c0_58, %c0_59] : memref<4x8x1xf32, #tpu.memory_space<vmem>>, vector<4x8x1xf32>
      tpu.vector_store %arg12[%c0_57, %c0_58, %c0_59], %74 {strides = array<i32>} : memref<4x8x1xf32, #tpu.memory_space<vmem>>, vector<4x8x1xf32>,
      %cst_60 = arith.constant 0.000000e+00 : f32
      %76 = vector.broadcast %cst_60 : f32 to vector<4x8x8xf32>
      %c0_61 = arith.constant 0 : index
      %c0_62 = arith.constant 0 : index
      %c0_63 = arith.constant 0 : index
      %77 = vector.load %arg13[%c0_61, %c0_62, %c0_63] : memref<4x8x8xf32, #tpu.memory_space<vmem>>, vector<4x8x8xf32>
      tpu.vector_store %arg13[%c0_61, %c0_62, %c0_63], %76 {strides = array<i32>} : memref<4x8x8xf32, #tpu.memory_space<vmem>>, vector<4x8x8xf32>,
    } else {
    }
    %c0 = arith.constant 0 : index
    %c0_1 = arith.constant 0 : index
    %c0_2 = arith.constant 0 : index
    %c0_3 = arith.constant 0 : index
    %c0_4 = arith.constant 0 : index
    %3 = vector.load %arg3[%c0, %c0_1, %c0_2, %c0_3, %c0_4] : memref<1x4x1x8x8xbf16, #tpu.memory_space<vmem>>, vector<1x4x1x8x8xbf16>
    %4 = vector.shape_cast %3 : vector<1x4x1x8x8xbf16> to vector<4x8x8xbf16>
    %5 = arith.extf %4 : vector<4x8x8xbf16> to vector<4x8x8xf32>
    %c0_5 = arith.constant 0 : index
    %c0_6 = arith.constant 0 : index
    %c0_7 = arith.constant 0 : index
    %c0_8 = arith.constant 0 : index
    %c0_9 = arith.constant 0 : index
    %6 = vector.load %arg4[%c0_5, %c0_6, %c0_7, %c0_8, %c0_9] : memref<1x4x1x8x8xbf16, #tpu.memory_space<vmem>>, vector<1x4x1x8x8xbf16>
    %7 = vector.shape_cast %6 : vector<1x4x1x8x8xbf16> to vector<4x8x8xbf16>
    %8 = arith.extf %7 : vector<4x8x8xbf16> to vector<4x8x8xf32>
    %c0_10 = arith.constant 0 : index
    %c0_11 = arith.constant 0 : index
    %c0_12 = arith.constant 0 : index
    %c0_13 = arith.constant 0 : index
    %c0_14 = arith.constant 0 : index
    %9 = vector.load %arg5[%c0_10, %c0_11, %c0_12, %c0_13, %c0_14] : memref<1x4x1x8x8xbf16, #tpu.memory_space<vmem>>, vector<1x4x1x8x8xbf16>
    %10 = vector.shape_cast %9 : vector<1x4x1x8x8xbf16> to vector<4x8x8xbf16>
    %c0_15 = arith.constant 0 : index
    %c0_16 = arith.constant 0 : index
    %c0_17 = arith.constant 0 : index
    %11 = vector.load %arg6[%c0_15, %c0_16, %c0_17] : memref<1x8x8xf32, #tpu.memory_space<vmem>>, vector<1x8x8xf32>
    %12 = vector.shape_cast %11 : vector<1x8x8xf32> to vector<8x8xf32>
    %c0_18 = arith.constant 0 : index
    %c0_19 = arith.constant 0 : index
    %c0_20 = arith.constant 0 : index
    %13 = vector.load %arg7[%c0_18, %c0_19, %c0_20] : memref<1x8x8xf32, #tpu.memory_space<vmem>>, vector<1x8x8xf32>
    %14 = vector.shape_cast %13 : vector<1x8x8xf32> to vector<8x8xf32>
    %15 = vector.extract_strided_slice %5 {offsets = [0, 0, 0], sizes = [4, 8, 4], strides = [1, 1, 1]} : vector<4x8x8xf32> to vector<4x8x4xf32>
    %16 = vector.extract_strided_slice %5 {offsets = [0, 0, 4], sizes = [4, 8, 4], strides = [1, 1, 1]} : vector<4x8x8xf32> to vector<4x8x4xf32>
    %cst = arith.constant 0.000000e+00 : f32
    %17 = vector.broadcast %cst : f32 to vector<4x8x4xf32>
    %18 = arith.subf %17, %16 : vector<4x8x4xf32>
    %19 = tpu.concatenate %18, %15 in 2 : vector<4x8x4xf32>, vector<4x8x4xf32> -> vector<4x8x8xf32>
    %20 = vector.shape_cast %12 : vector<8x8xf32> to vector<1x8x8xf32>
    %21 = vector.broadcast %20 : vector<1x8x8xf32> to vector<4x8x8xf32>
    %22 = arith.mulf %5, %21 : vector<4x8x8xf32>
    %23 = vector.shape_cast %14 : vector<8x8xf32> to vector<1x8x8xf32>
    %24 = vector.broadcast %23 : vector<1x8x8xf32> to vector<4x8x8xf32>
    %25 = arith.mulf %19, %24 : vector<4x8x8xf32>
    %26 = arith.addf %22, %25 : vector<4x8x8xf32>
    %27 = arith.truncf %26 : vector<4x8x8xf32> to vector<4x8x8xbf16>
    %c0_21 = arith.constant 0 : index
    %c0_22 = arith.constant 0 : index
    %c0_23 = arith.constant 0 : index
    %28 = vector.load %arg8[%c0_21, %c0_22, %c0_23] : memref<1x8x8xf32, #tpu.memory_space<vmem>>, vector<1x8x8xf32>
    %29 = vector.shape_cast %28 : vector<1x8x8xf32> to vector<8x8xf32>
    %c0_24 = arith.constant 0 : index
    %c0_25 = arith.constant 0 : index
    %c0_26 = arith.constant 0 : index
    %30 = vector.load %arg9[%c0_24, %c0_25, %c0_26] : memref<1x8x8xf32, #tpu.memory_space<vmem>>, vector<1x8x8xf32>
    %31 = vector.shape_cast %30 : vector<1x8x8xf32> to vector<8x8xf32>
    %32 = vector.extract_strided_slice %8 {offsets = [0, 0, 0], sizes = [4, 8, 4], strides = [1, 1, 1]} : vector<4x8x8xf32> to vector<4x8x4xf32>
    %33 = vector.extract_strided_slice %8 {offsets = [0, 0, 4], sizes = [4, 8, 4], strides = [1, 1, 1]} : vector<4x8x8xf32> to vector<4x8x4xf32>
    %cst_27 = arith.constant 0.000000e+00 : f32
    %34 = vector.broadcast %cst_27 : f32 to vector<4x8x4xf32>
    %35 = arith.subf %34, %33 : vector<4x8x4xf32>
    %36 = tpu.concatenate %35, %32 in 2 : vector<4x8x4xf32>, vector<4x8x4xf32> -> vector<4x8x8xf32>
    %37 = vector.shape_cast %29 : vector<8x8xf32> to vector<1x8x8xf32>
    %38 = vector.broadcast %37 : vector<1x8x8xf32> to vector<4x8x8xf32>
    %39 = arith.mulf %8, %38 : vector<4x8x8xf32>
    %40 = vector.shape_cast %31 : vector<8x8xf32> to vector<1x8x8xf32>
    %41 = vector.broadcast %40 : vector<1x8x8xf32> to vector<4x8x8xf32>
    %42 = arith.mulf %36, %41 : vector<4x8x8xf32>
    %43 = arith.addf %39, %42 : vector<4x8x8xf32>
    %44 = arith.truncf %43 : vector<4x8x8xf32> to vector<4x8x8xbf16>
    "tpu.trace_start"() <{level = 10 : i32, message = "hqd,hkd->hqk"}> : () -> ()
    %cst_28 = arith.constant dense<0.000000e+00> : vector<4x8x8xf32>
    %45 = tpu.matmul %27, %44, %cst_28 {dimension_numbers = #tpu.dot_dimension_numbers<[2], [2], [1], [1], [0, 0, 0, 1, 1, 1], [0], [0]>} : vector<4x8x8xbf16>, vector<4x8x8xbf16>, vector<4x8x8xf32> -> vector<4x8x8xf32>
    "tpu.trace_stop"() : () -> ()
    %c0_29 = arith.constant 0 : index
    %c0_30 = arith.constant 0 : index
    %c0_31 = arith.constant 0 : index
    %46 = vector.load %arg11[%c0_29, %c0_30, %c0_31] : memref<4x8x1xf32, #tpu.memory_space<vmem>>, vector<4x8x1xf32>
    %cst_32 = arith.constant dense<0xFF800000> : vector<4x8xf32>
    %47 = vector.multi_reduction <maximumf>, %45, %cst_32 [2] : vector<4x8x8xf32> to vector<4x8xf32>
    %48 = vector.shape_cast %47 : vector<4x8xf32> to vector<4x8x1xf32>
    %49 = arith.maximumf %46, %48 : vector<4x8x1xf32>
    %50 = arith.subf %46, %49 : vector<4x8x1xf32>
    %51 = math.exp %50 : vector<4x8x1xf32>
    %52 = vector.broadcast %49 : vector<4x8x1xf32> to vector<4x8x8xf32>
    %53 = arith.subf %45, %52 : vector<4x8x8xf32>
    %54 = math.exp %53 : vector<4x8x8xf32>
    %c0_33 = arith.constant 0 : index
    %c0_34 = arith.constant 0 : index
    %c0_35 = arith.constant 0 : index
    %55 = vector.load %arg12[%c0_33, %c0_34, %c0_35] : memref<4x8x1xf32, #tpu.memory_space<vmem>>, vector<4x8x1xf32>
    %56 = arith.mulf %51, %55 : vector<4x8x1xf32>
    %cst_36 = arith.constant dense<0.000000e+00> : vector<4x8xf32>
    %57 = vector.multi_reduction <add>, %54, %cst_36 [2] : vector<4x8x8xf32> to vector<4x8xf32>
    %58 = vector.shape_cast %57 : vector<4x8xf32> to vector<4x8x1xf32>
    %59 = arith.addf %56, %58 : vector<4x8x1xf32>
    %c0_37 = arith.constant 0 : index
    %c0_38 = arith.constant 0 : index
    %c0_39 = arith.constant 0 : index
    %60 = vector.load %arg12[%c0_37, %c0_38, %c0_39] : memref<4x8x1xf32, #tpu.memory_space<vmem>>, vector<4x8x1xf32>
    tpu.vector_store %arg12[%c0_37, %c0_38, %c0_39], %59 {strides = array<i32>} : memref<4x8x1xf32, #tpu.memory_space<vmem>>, vector<4x8x1xf32>,
    %c0_40 = arith.constant 0 : index
    %c0_41 = arith.constant 0 : index
    %c0_42 = arith.constant 0 : index
    %61 = vector.load %arg13[%c0_40, %c0_41, %c0_42] : memref<4x8x8xf32, #tpu.memory_space<vmem>>, vector<4x8x8xf32>
    %62 = vector.broadcast %51 : vector<4x8x1xf32> to vector<4x8x8xf32>
    %63 = arith.mulf %62, %61 : vector<4x8x8xf32>
    %64 = arith.truncf %54 : vector<4x8x8xf32> to vector<4x8x8xbf16>
    "tpu.trace_start"() <{level = 10 : i32, message = "hqk,hkd->hqd"}> : () -> ()
    %cst_43 = arith.constant dense<0.000000e+00> : vector<4x8x8xf32>
    %65 = tpu.matmul %64, %10, %cst_43 {dimension_numbers = #tpu.dot_dimension_numbers<[2], [1], [1], [2], [0, 0, 0, 1, 1, 2], [0], [0]>} : vector<4x8x8xbf16>, vector<4x8x8xbf16>, vector<4x8x8xf32> -> vector<4x8x8xf32>
    "tpu.trace_stop"() : () -> ()
    %66 = arith.addf %63, %65 : vector<4x8x8xf32>
    %c0_44 = arith.constant 0 : index
    %c0_45 = arith.constant 0 : index
    %c0_46 = arith.constant 0 : index
    %67 = vector.load %arg13[%c0_44, %c0_45, %c0_46] : memref<4x8x8xf32, #tpu.memory_space<vmem>>, vector<4x8x8xf32>
    tpu.vector_store %arg13[%c0_44, %c0_45, %c0_46], %66 {strides = array<i32>} : memref<4x8x8xf32, #tpu.memory_space<vmem>>, vector<4x8x8xf32>,
    %c0_47 = arith.constant 0 : index
    %c0_48 = arith.constant 0 : index
    %c0_49 = arith.constant 0 : index
    %68 = vector.load %arg11[%c0_47, %c0_48, %c0_49] : memref<4x8x1xf32, #tpu.memory_space<vmem>>, vector<4x8x1xf32>
    tpu.vector_store %arg11[%c0_47, %c0_48, %c0_49], %49 {strides = array<i32>} : memref<4x8x1xf32, #tpu.memory_space<vmem>>, vector<4x8x1xf32>,
    %c0_i32_50 = arith.constant 0 : i32
    %69 = arith.cmpi eq, %arg2, %c0_i32_50 : i32
    %70 = arith.extui %69 : i1 to i32
    %c0_i32_51 = arith.constant 0 : i32
    %71 = arith.cmpi ne, %70, %c0_i32_51 : i32
    scf.if %71 {
      %c0_52 = arith.constant 0 : index
      %c0_53 = arith.constant 0 : index
      %c0_54 = arith.constant 0 : index
      %72 = vector.load %arg12[%c0_52, %c0_53, %c0_54] : memref<4x8x1xf32, #tpu.memory_space<vmem>>, vector<4x8x1xf32>
      %73 = tpu.reciprocal %72 {approx = true} : vector<4x8x1xf32> -> vector<4x8x1xf32>
      %c0_55 = arith.constant 0 : index
      %c0_56 = arith.constant 0 : index
      %c0_57 = arith.constant 0 : index
      %74 = vector.load %arg13[%c0_55, %c0_56, %c0_57] : memref<4x8x8xf32, #tpu.memory_space<vmem>>, vector<4x8x8xf32>
      %75 = vector.broadcast %73 : vector<4x8x1xf32> to vector<4x8x8xf32>
      %76 = arith.mulf %74, %75 : vector<4x8x8xf32>
      %77 = arith.truncf %76 : vector<4x8x8xf32> to vector<4x8x8xbf16>
      %c0_58 = arith.constant 0 : index
      %c0_59 = arith.constant 0 : index
      %c0_60 = arith.constant 0 : index
      %c0_61 = arith.constant 0 : index
      %78 = vector.load %arg10[%c0_58, %c0_59, %c0_60, %c0_61] : memref<4x1x8x8xbf16, #tpu.memory_space<vmem>>, vector<4x1x8x8xbf16>
      %79 = vector.shape_cast %78 : vector<4x1x8x8xbf16> to vector<4x8x8xbf16>
      %80 = vector.shape_cast %77 : vector<4x8x8xbf16> to vector<4x1x8x8xbf16>
      tpu.vector_store %arg10[%c0_58, %c0_59, %c0_60, %c0_61], %80 {strides = array<i32>} : memref<4x1x8x8xbf16, #tpu.memory_space<vmem>>, vector<4x1x8x8xbf16>,
    } else {
    }
    return
  }
  func.func @transform_0(%arg0: i32, %arg1: i32, %arg2: i32) -> (i32, i32, i32, i32, i32) {
    %c0_i32 = arith.constant 0 : i32
    %c0_i32_0 = arith.constant 0 : i32
    %c0_i32_1 = arith.constant 0 : i32
    %c0_i32_2 = arith.constant 0 : i32
    return %c0_i32, %c0_i32_0, %arg0, %arg1, %c0_i32_1 : i32, i32, i32, i32, i32
  }
  func.func @transform_1(%arg0: i32, %arg1: i32, %arg2: i32) -> (i32, i32, i32, i32, i32) {
    %c1_i32 = arith.constant 1 : i32
    %c0_i32 = arith.constant 0 : i32
    %c0_i32_0 = arith.constant 0 : i32
    %c0_i32_1 = arith.constant 0 : i32
    return %c1_i32, %c0_i32, %arg0, %arg2, %c0_i32_0 : i32, i32, i32, i32, i32
  }
  func.func @transform_2(%arg0: i32, %arg1: i32, %arg2: i32) -> (i32, i32, i32, i32, i32) {
    %c2_i32 = arith.constant 2 : i32
    %c0_i32 = arith.constant 0 : i32
    %c0_i32_0 = arith.constant 0 : i32
    %c0_i32_1 = arith.constant 0 : i32
    return %c2_i32, %c0_i32, %arg0, %arg2, %c0_i32_0 : i32, i32, i32, i32, i32
  }
  func.func @transform_3(%arg0: i32, %arg1: i32, %arg2: i32) -> (i32, i32, i32) {
    %c0_i32 = arith.constant 0 : i32
    %c0_i32_0 = arith.constant 0 : i32
    return %arg0, %arg1, %c0_i32 : i32, i32, i32
  }
  func.func @transform_4(%arg0: i32, %arg1: i32, %arg2: i32) -> (i32, i32, i32) {
    %c0_i32 = arith.constant 0 : i32
    %c0_i32_0 = arith.constant 0 : i32
    return %arg0, %arg1, %c0_i32 : i32, i32, i32
  }
  func.func @transform_5(%arg0: i32, %arg1: i32, %arg2: i32) -> (i32, i32, i32) {
    %c0_i32 = arith.constant 0 : i32
    %c0_i32_0 = arith.constant 0 : i32
    return %arg0, %arg2, %c0_i32 : i32, i32, i32
  }
  func.func @transform_6(%arg0: i32, %arg1: i32, %arg2: i32) -> (i32, i32, i32) {
    %c0_i32 = arith.constant 0 : i32
    %c0_i32_0 = arith.constant 0 : i32
    return %arg0, %arg2, %c0_i32 : i32, i32, i32
  }
  func.func @transform_7(%arg0: i32, %arg1: i32, %arg2: i32) -> (i32, i32, i32, i32) {
    %c0_i32 = arith.constant 0 : i32
    %c0_i32_0 = arith.constant 0 : i32
    %c0_i32_1 = arith.constant 0 : i32
    return %c0_i32, %arg0, %arg1, %c0_i32_0 : i32, i32, i32, i32
  }
}

module attributes {stable_mosaic.version = 11 : i64} {
  func.func @_out_proj_kernel(%arg0: i32, %arg1: i32, %arg2: i32, %arg3: memref<1x16x8xbf16, #tpu.memory_space<vmem>>, %arg4: memref<1x8x32xbf16, #tpu.memory_space<vmem>>, %arg5: memref<16x32xf32, #tpu.memory_space<vmem>>, %arg6: memref<16x32xf32, #tpu.memory_space<vmem>>) attributes {dimension_semantics = [#tpu.dimension_semantics<parallel>, #tpu.dimension_semantics<parallel>, #tpu.dimension_semantics<arbitrary>], iteration_bounds = array<i64: 1, 1, 4>, scalar_prefetch = 0 : i64, scratch_operands = 1 : i64, tpu.core_type = #tpu.core_type<tc>, window_params = [{transform_indices = @transform_0, window_bounds = array<i64: 1, 16, 8>}, {transform_indices = @transform_1, window_bounds = array<i64: 1, 8, 32>}, {transform_indices = @transform_2, window_bounds = array<i64: 16, 32>}]} {
    %c0_i32 = arith.constant 0 : i32
    %0 = arith.cmpi eq, %arg2, %c0_i32 : i32
    %1 = arith.extui %0 : i1 to i32
    %c0_i32_0 = arith.constant 0 : i32
    %2 = arith.cmpi ne, %1, %c0_i32_0 : i32
    scf.if %2 {
      %cst_11 = arith.constant 0.000000e+00 : f32
      %14 = vector.broadcast %cst_11 : f32 to vector<16x32xf32>
      %c0_12 = arith.constant 0 : index
      %c0_13 = arith.constant 0 : index
      %15 = vector.load %arg6[%c0_12, %c0_13] : memref<16x32xf32, #tpu.memory_space<vmem>>, vector<16x32xf32>
      tpu.vector_store %arg6[%c0_12, %c0_13], %14 {strides = array<i32>} : memref<16x32xf32, #tpu.memory_space<vmem>>, vector<16x32xf32>,
    } else {
    }
    %c0 = arith.constant 0 : index
    %c0_1 = arith.constant 0 : index
    %3 = vector.load %arg6[%c0, %c0_1] : memref<16x32xf32, #tpu.memory_space<vmem>>, vector<16x32xf32>
    %c0_2 = arith.constant 0 : index
    %c0_3 = arith.constant 0 : index
    %c0_4 = arith.constant 0 : index
    %4 = vector.load %arg3[%c0_2, %c0_3, %c0_4] : memref<1x16x8xbf16, #tpu.memory_space<vmem>>, vector<1x16x8xbf16>
    %5 = vector.shape_cast %4 : vector<1x16x8xbf16> to vector<16x8xbf16>
    %c0_5 = arith.constant 0 : index
    %c0_6 = arith.constant 0 : index
    %c0_7 = arith.constant 0 : index
    %6 = vector.load %arg4[%c0_5, %c0_6, %c0_7] : memref<1x8x32xbf16, #tpu.memory_space<vmem>>, vector<1x8x32xbf16>
    %7 = vector.shape_cast %6 : vector<1x8x32xbf16> to vector<8x32xbf16>
    %cst = arith.constant dense<0.000000e+00> : vector<16x32xf32>
    %8 = tpu.matmul %5, %7, %cst {dimension_numbers = #tpu.dot_dimension_numbers<[1], [0], [0], [1], [0, 0, 1, 1], [], []>} : vector<16x8xbf16>, vector<8x32xbf16>, vector<16x32xf32> -> vector<16x32xf32>
    %9 = arith.addf %3, %8 : vector<16x32xf32>
    %c0_8 = arith.constant 0 : index
    %c0_9 = arith.constant 0 : index
    %10 = vector.load %arg6[%c0_8, %c0_9] : memref<16x32xf32, #tpu.memory_space<vmem>>, vector<16x32xf32>
    tpu.vector_store %arg6[%c0_8, %c0_9], %9 {strides = array<i32>} : memref<16x32xf32, #tpu.memory_space<vmem>>, vector<16x32xf32>,
    %c3_i32 = arith.constant 3 : i32
    %11 = arith.cmpi eq, %arg2, %c3_i32 : i32
    %12 = arith.extui %11 : i1 to i32
    %c0_i32_10 = arith.constant 0 : i32
    %13 = arith.cmpi ne, %12, %c0_i32_10 : i32
    scf.if %13 {
      %c0_11 = arith.constant 0 : index
      %c0_12 = arith.constant 0 : index
      %14 = vector.load %arg6[%c0_11, %c0_12] : memref<16x32xf32, #tpu.memory_space<vmem>>, vector<16x32xf32>
      %c0_13 = arith.constant 0 : index
      %c0_14 = arith.constant 0 : index
      %15 = vector.load %arg5[%c0_13, %c0_14] : memref<16x32xf32, #tpu.memory_space<vmem>>, vector<16x32xf32>
      tpu.vector_store %arg5[%c0_13, %c0_14], %14 {strides = array<i32>} : memref<16x32xf32, #tpu.memory_space<vmem>>, vector<16x32xf32>,
    } else {
    }
    return
  }
  func.func @transform_0(%arg0: i32, %arg1: i32, %arg2: i32) -> (i32, i32, i32) {
    %c0_i32 = arith.constant 0 : i32
    %c0_i32_0 = arith.constant 0 : i32
    return %arg2, %arg0, %c0_i32 : i32, i32, i32
  }
  func.func @transform_1(%arg0: i32, %arg1: i32, %arg2: i32) -> (i32, i32, i32) {
    %c0_i32 = arith.constant 0 : i32
    %c0_i32_0 = arith.constant 0 : i32
    return %arg2, %c0_i32, %arg1 : i32, i32, i32
  }
  func.func @transform_2(%arg0: i32, %arg1: i32, %arg2: i32) -> (i32, i32) {
    %c0_i32 = arith.constant 0 : i32
    return %arg0, %arg1 : i32, i32
  }
}

</mosaic_0001>

<bundles_post_ra>
// kernel: optimized_mha_forward.3
= control target key start
LH: loop header
LB: loop body
LE: loop exit
PB: predicated region body
PF: predicated region fallthrough
CT: control target
= control target key end

     0   :  { %s1038_s0 = inlined_call_operand.hbm [shape: bf16[16,32], index: 0, kind: input, shape index: {}]   ;;  %s1039_s1 = inlined_call_operand.hbm [shape: bf16[3,4,32,8], index: 1, kind: input, shape index: {}]   ;;  %s1040_s2 = inlined_call_operand.hbm [shape: bf16[3,4,16,8], index: 2, kind: output, shape index: {}]  }
   0x1   :  { %1050 = sst [smem:[#allocation15_spill]] %s1038_s0 }
   0x2   :  { %7 = vsyncpa [#allocation4], 0 }
   0x3   :  { %8 = vsyncpa [#allocation7], 0 }
   0x4   :  { %10 = vsyncpa [#allocation7 + $0x1], 0 }
   0x5   :  { %11 = vsyncpa [#allocation5], 0 }
   0x6   :  { %13 = vsyncpa [#allocation5 + $0x1], 0  ;;  %s784_s9 = smov 0   ;;  %s786_s10 = smov 0  }
   0x7   :  { %s788_s11 = smov 0   ;;  %s790_s12 = smov 0  }
   0x8   :  { %s792_s13 = smov 0   ;;  %s794_s14 = smov 0  }
   0x9   :  { %s796_s15 = smov 0   ;;  %s798_s16 = smov 0  }
   0xa LB: > { %1051 = sst [smem:[#allocation12_spill]] %s750_s14  ;;  %s462_s17 = sadd.s32 4294967295, %s758_s16   ;;  %s758_s16 = sphi %s798_s16, %s19_s16   ;;  %s754_s15 = sphi %s796_s15, %s1078_s15   ;;  %s750_s14 = sphi %s794_s14, %s1072_s14   ;;  %s746_s13 = sphi %s792_s13, %s1077_s13   ;;  %s742_s12 = sphi %s790_s12, %s1071_s12   ;;  %s738_s11 = sphi %s788_s11, %s1076_s11   ;;  %s734_s10 = sphi %s786_s10, %s1075_s10   ;;  %s730_s9 = sphi %s784_s9, %s1074_s9  }
   0xb   : > { %s463_s18 = sadd.s32 4294967294, %s758_s16   ;;  %p97_p0 = scmp.ne.s32.totalorder %s734_s10, %s730_s9 }
   0xc   : > { %p828_p1 = scmp.eq.s32.totalorder %s462_s17, 0  ;;  %p832_p2 = scmp.eq.s32.totalorder %s462_s17, 11 }
   0xd   : > { %p131_p3 = scmp.eq.s32.totalorder %s463_s18, 11  ;;  %p464_p5 = scmp.ge.s32.totalorder %s758_s16, 1 }
   0xe   : > { %s1052_s19 = scalar_select %p828_p1, 1, 0 }
   0xf   : > { %s1053_s20 = scalar_select %p832_p2, 1, 0 }
  0x10   : > { %p838_p4 = por %p828_p1, %p97_p0  ;;  %p843_p6 = por %p131_p3, %p97_p0 }
  0x11   : > { %p138_p7 = scmp.lt.s32.totalorder %s758_s16, 13  ;;  %s760_s24 = smov [#allocation3]  }
  0x12   : > { %s1054_s21 = scalar_select %p838_p4, 1, 0 }
  0x13   : > { %s1055_s22 = scalar_select %p843_p6, 1, 0 }
  0x14   : > { %p848_p8 = pnand %p464_p5, %p138_p7  ;;  %s154_s25 = sshll.u32 %s760_s24, 4  ;;  %s155_s25 = int_to_ptr.vmem [resolvable:$true] %s154_s25 }
  0x15   : > { %s1058_s0 = sld [smem:[#allocation15_spill]] }
  0x16   : > { %s1056_s23 = scalar_select %p848_p8, 1, 0 }
  0x17   : > { %p508_p9 = pneg %p848_p8 }
  0x19   : > { %p856_p10 = pnand %p508_p9, %p828_p1 }
  0x1b   : > { %s598_s29 = scalar_lea.hbm %s1058_s0, 128  ;;  %p600_p12 = pneg %p856_p10 }
  0x1c   : > { %p599_p11 = scmp.ne.s32.totalorder %s1058_s0, %s598_s29  ;;  %p605_p3 = scmp.lt.u32.totalorder %s598_s29, %s1058_s0 }
  0x1e   : > { %p601_p13 = pnand %p600_p12, %p599_p11 }
  0x20   : > { %p602_p0 = pneg %p601_p13 }
  0x22   : > { %p607_p5 = pnand %p605_p3, %p602_p0 }
  0x24   : > { %610 = shalt.err (!%p607_p5)
}
  0x25   : > { %s611_s6 = scalar_lea.vmem %s155_s25, 128  ;;  %p619_p4 = scmp.lt.s32.totalorder %s155_s25, %s155_s25 }
  0x26   : > { %p612_p7 = scmp.ne.s32.totalorder %s155_s25, %s611_s6  ;;  %p620_p1 = scmp.lt.s32.totalorder %s611_s6, %s611_s6 }
  0x28   : > { %p614_p9 = pnand %p612_p7, %p600_p12  ;;  %p621_p8 = por %p620_p1, %p619_p4 }
  0x2a   : > { %p615_p6 = pneg %p614_p9 }
  0x2c   : > { %p622_p2 = pnand %p621_p8, %p615_p6 }
  0x2e   : > { %625 = shalt.err (!%p622_p2)
}
  0x2f   : > { %s1045_s7 = smov 64   ;;  %s1046_s8 = smov 4  }
  0x30   : > { %511 = dma.hbm_to_vmem [thread:$0]  (!%p856_p10), %s1058_s0, 128, %s155_s25, [#allocation4], %s1045_s7, %s1045_s7, %s1046_s8  }
  0x31   : > { %s41_s24 = sadd.s32 1, %s750_s14  ;;  %s45_s27 = sadd.s32 1, %s754_s15 }
  0x32   : > { %p43_p1 = scmp.ge.s32.totalorder %s41_s24, 4  ;;  %s84_s28 = sadd.s32 1, %s738_s11 }
  0x33   : > { %p91_p2 = scmp.ne.s32.totalorder %s738_s11, %s734_s10  ;;  %p92_p4 = scmp.eq.s32.totalorder %s758_s16, 0 }
  0x34   : > { %s1080_s24 = smov (%p43_p1, %s41_s24), 0  ;;  %s1082_s27 = smov (!%p43_p1, %s45_s27), %s754_s15 }
  0x35   : > { %1059 = sst [smem:[#allocation13_spill]] %s1080_s24  ;;  %s78_s26 = ssub.s32 %s750_s14, %s1080_s24 }
  0x36   : > { %p47_p6 = scmp.ge.s32.totalorder %s1082_s27, 3  ;;  %p1060_p8 = scmp.ne.s32.totalorder %s1053_s20, 0 }
  0x37   : > { %p896_p10 = por %p92_p4, %p91_p2  ;;  %p521_p12 = scmp.lt.s32.totalorder %s758_s16, 12 }
  0x38   : > { %p892_p11 = por %p1060_p8, %p91_p2  ;;  %s1084_s27 = smov (%p47_p6, %s1082_s27), 0 }
  0x39   : > { %1063 = sst [smem:[#allocation14_spill]] %s1084_s27  ;;  %s168_s30 = sand.u32 1, %s738_s11  }
  0x3a   : > { %s468_s3 = sshll.u32 %s750_s14, 2  ;;  %s77_s4 = ssub.s32 %s754_s15, %s1084_s27 }
  0x3b   : > { %s79_s5 = sor.u32 %s78_s26, %s77_s4  ;;  %s467_s6 = sshll.u32 %s168_s30, 4 }
  0x3c   : > { %p82_p13 = scmp.eq.s32.totalorder %s79_s5, 0  ;;  %s469_s20 = sshll.u32 %s754_s15, 4 }
  0x3d   : > { %s172_s17 = scalar_lea.vmem [#allocation6], %s467_s6  ;;  %s180_s8 = sadd.s32 %s469_s20, %s468_s3 }
  0x3e   : > { %s183_s18 = sshll.u32 %s172_s17, 4  ;;  %s470_s0 = sshll.u32 %s180_s8, 6  ;;  %s911_s18 = int_to_ptr.vmem [resolvable:$true] %s183_s18 }
  0x3f   : > { %s909_s7 = scalar_select %p82_p13, %s738_s11, %s84_s28  }
  0x40   : > { %p917_p0 = pnand %p521_p12, %p896_p10  ;;  %s924_s26 = scalar_lea.hbm %s1039_s1, %s470_s0 }
  0x41   : > { %s926_s28 = scalar_lea.sflag [#allocation7], %s168_s30  ;;  %s626_s8 = scalar_lea.hbm %s924_s26, 256 }
  0x42   : > { %p627_p3 = scmp.ne.s32.totalorder %s924_s26, %s626_s8  ;;  %p628_p5 = pneg %p917_p0 }
  0x43   : > { %s631_s27 = scalar_lea.hbm %s1039_s1, 3072  ;;  %p632_p1 = scmp.lt.u32.totalorder %s924_s26, %s1039_s1 }
  0x44   : > { %p629_p7 = pnand %p628_p5, %p627_p3  ;;  %p633_p2 = scmp.lt.u32.totalorder %s631_s27, %s626_s8 }
  0x45   : > { %p635_p6 = scmp.lt.u32.totalorder %s626_s8, %s924_s26 }
  0x46   : > { %p630_p9 = pneg %p629_p7  ;;  %p634_p4 = por %p633_p2, %p632_p1 }
  0x48   : > { %p636_p8 = por %p635_p6, %p634_p4 }
  0x4a   : > { %p637_p10 = pnand %p636_p8, %p630_p9 }
  0x4c   : > { %640 = shalt.err (!%p637_p10)
}
  0x4d   : > { %s641_s30 = scalar_lea.vmem %s911_s18, 256  ;;  %s763_s4 = smov [#allocation6]  }
  0x4e   : > { %p642_p12 = scmp.ne.s32.totalorder %s911_s18, %s641_s30  ;;  %s646_s5 = sshll.u32 %s763_s4, 4  ;;  %s647_s5 = int_to_ptr.vmem [resolvable:$false] %s646_s5 }
  0x4f   : > { %s648_s6 = scalar_lea.vmem %s647_s5, 512  ;;  %p649_p7 = scmp.lt.s32.totalorder %s911_s18, %s647_s5 }
  0x50   : > { %p644_p13 = pnand %p642_p12, %p628_p5  ;;  %p650_p1 = scmp.lt.s32.totalorder %s648_s6, %s641_s30 }
  0x52   : > { %p645_p3 = pneg %p644_p13  ;;  %p651_p2 = por %p650_p1, %p649_p7 }
  0x54   : > { %p652_p4 = pnand %p651_p2, %p645_p3 }
  0x56   : > { %655 = shalt.err (!%p652_p4)
}
  0x57   : > { %s1065_s20 = smov 4   ;;  %s1066_s17 = smov 64  }
  0x58   : > { %515 = dma.hbm_to_vmem [thread:$0]  (!%p917_p0), %s924_s26, 256, %s911_s18, %s926_s28, %s1066_s17, %s1066_s17, %s1065_s20  }
  0x59   : > { %p1067_p5 = scmp.ne.s32.totalorder %s1056_s23, 0 }
  0x5a   : > { %p1068_p9 = scmp.ne.s32.totalorder (!%p1067_p5), %s1052_s19, 0 }
  0x5b   : > { %195 = sbr.rel (%p1067_p5) target bundleno = 353 (0x161), region = 28 }
  0x62   : > { %717 = dma.done.wait (%p1068_p9), [#allocation4], 128  }
  0x63   : > { %719 = vsyncadd (%p1068_p9), [#allocation4], 4294967168  ;;  %s964_s8 = sand.u32 1, %s734_s10   ;;  %p1069_p6 = scmp.ne.s32.totalorder %s1054_s21, 0 }
  0x64   : > { %s473_s24 = sshll.u32 %s964_s8, 4  ;;  %s202_s25 = scalar_lea.sflag [#allocation7], %s964_s8 }
  0x65   : > { %s205_s14 = scalar_lea.vmem [#allocation6], %s473_s24 }
  0x66   : > { %721 = dma.done.wait (%p1069_p6), %s202_s25, 256  }
  0x67   : > { %723 = vsyncadd (%p1069_p6), %s202_s25, 4294967040  ;;  %vm234_vm0 = vcmask 64512   ;;  %v764_v0 = vmov 0.0   ;;  %vm765_vm1 = vmmov 0   ;;  %v595_v1 = vld [vmem:[%s205_s14] sm:$0xff]   ;;  %v596_v2 = vld [vmem:[%s205_s14 + $0x8] sm:$0xff]  }
  0x68   : > { %235 = vst.msk [vmem:[#allocation2] sm:$0xff] %vm234_vm0, %v764_v0  ;;  %236 = vst.msk [vmem:[#allocation2 + $0x8] sm:$0xff] %vm234_vm0, %v764_v0  ;;  %492 = vmatprep.subr.bf16.mxu0 %v764_v0  ;;  %496 = vmatprep.mubr.msk.bf16.mxu0 %vm765_vm1, %v764_v0  ;;  %v597_v3 = vld [vmem:[#allocation3] sm:$0xff]   ;;  %vm262_vm2 = vcmask 261120   ;;  %s474_s19 = sshll.u32 %s964_s8, 3  ;;  %s482_s21 = sshll.u32 %s742_s12, 1 }
  0x69   : > { %493 = vmatpush3.bf16.msra.mxu0 %v595_v1  ;;  %s483_s23 = sshll.u32 %s746_s13, 3  ;;  %s225_s28 = scalar_lea.vmem [#allocation8], %s474_s19  ;;  %vm325_vm3 = vcmask 60416  }
  0x6a   : > { %494 = vmatprep.subr.bf16.mxu0 %v764_v0  ;;  %s343_s18 = sadd.s32 %s483_s23, %s482_s21  ;;  %s346_s27 = sshll.u32 %s225_s28, 4  ;;  %s984_s27 = int_to_ptr.vmem [resolvable:$true] %s346_s27 }
  0x6b   : > { %s484_s26 = sshll.u32 %s343_s18, 6  ;;  %s329_s12 = scalar_lea.sflag [#allocation5], %s964_s8 }
  0x6c   : > { %s982_s30 = scalar_lea.hbm %s1040_s2, %s484_s26  ;;  %s656_s13 = scalar_lea.vmem %s984_s27, 128 }
  0x6d   : > { %495 = vmatpush3.bf16.msra.mxu0 %v596_v2  ;;  %p657_p0 = scmp.ne.s32.totalorder %s984_s27, %s656_s13  ;;  %s766_s4 = smov [#allocation8]  }
  0x6e   : > { %s660_s5 = sshll.u32 %s766_s4, 4  ;;  %s661_s5 = int_to_ptr.vmem [resolvable:$false] %s660_s5 }
  0x6f   : > { %v237_v4 = vld [vmem:[#allocation2] sm:$0xff]  ;;  %v238_v6 = vld [vmem:[#allocation2 + $0x8] sm:$0xff]  ;;  %p658_p8 = pnand %p657_p0, %p892_p11  ;;  %s662_s6 = scalar_lea.vmem %s661_s5, 256 }
  0x70   : > { %497 = vmatmul.mubr.msk.bf16.vlgmr.msra.gmra.mrb[0].mxu0 %vm262_vm2, %v597_v3  ;;  %p663_p12 = scmp.lt.s32.totalorder %s984_s27, %s661_s5  ;;  %p664_p13 = scmp.lt.s32.totalorder %s662_s6, %s656_s13 }
  0x71   : > { %p659_p10 = pneg %p658_p8 }
  0x72   : > { %p665_p3 = por %p664_p13, %p663_p12 }
  0x74   : > { %p666_p7 = pnand %p665_p3, %p659_p10 }
 0x143   : > { %v300_v5 = vpop.f32.mrb[0].mxu0 }
 0x144   : > { %v307_v7 = vadd.f32 %v300_v5, %v237_v4  ;;  %v498_v8 = vpop.f32.mrb[1].mxu0 }
 0x145   : > { %v303_v9 = vpop.f32.mrb[2].mxu0 }
 0x146   : > { %310 = vst.msk [vmem:[#allocation2] sm:$0xff] %vm234_vm0, %v307_v7  ;;  %v308_v10 = vadd.f32 %v303_v9, %v238_v6  ;;  %v499_v11 = vpop.f32.mrb[3].mxu0 }
 0x148   : > { %311 = vst.msk [vmem:[#allocation2 + $0x8] sm:$0xff] %vm234_vm0, %v308_v10 }
 0x14d   : > { %v315_v12 = vld [vmem:[#allocation2] sm:$0xff] }
 0x14e   : > { %v487_v13 = vpack.c.bf16 %v315_v12, %v315_v12 }
 0x14f   : > { %v316_v14 = vld [vmem:[#allocation2 + $0x8] sm:$0xff] }
 0x150   : > { %v488_v15 = vpack.c.bf16 %v316_v14, %v316_v14  ;;  %326 = vst.msk [vmem:[%s225_s28] sm:$0xf] %vm325_vm3, %v487_v13 }
 0x152   : > { %327 = vst.msk [vmem:[%s225_s28 + $0x4] sm:$0xf] %vm325_vm3, %v488_v15 }
 0x153   : > { %669 = shalt.err (!%p666_p7)
}
 0x154   : > { %s670_s20 = scalar_lea.hbm %s982_s30, 128  ;;  %s674_s25 = scalar_lea.hbm %s1040_s2, 1536 }
 0x155   : > { %p671_p1 = scmp.ne.s32.totalorder %s982_s30, %s670_s20  ;;  %p675_p5 = scmp.lt.u32.totalorder %s982_s30, %s1040_s2 }
 0x156   : > { %p676_p9 = scmp.lt.u32.totalorder %s674_s25, %s670_s20  ;;  %p678_p0 = scmp.lt.u32.totalorder %s670_s20, %s982_s30 }
 0x157   : > { %p672_p2 = pnand %p671_p1, %p892_p11 }
 0x158   : > { %p677_p6 = por %p676_p9, %p675_p5 }
 0x159   : > { %p673_p4 = pneg %p672_p2 }
 0x15a   : > { %p679_p8 = por %p678_p0, %p677_p6 }
 0x15c   : > { %p680_p10 = pnand %p679_p8, %p673_p4 }
 0x15e   : > { %683 = shalt.err (!%p680_p10)
}
 0x15f   : > { %s767_s21 = smov 64   ;;  %s768_s23 = smov 4  }
 0x160   : > { %506 = dma.vmem_to_hbm [thread:$0]  (%p892_p11), %s984_s27, 128, %s982_s30, %s329_s12, %s767_s21, %s767_s21, %s768_s23  }
 0x161 PF: > { %p523_p12 = scmp.ge.s32.totalorder %s758_s16, 2  ;;  %s361_s18 = sand.u32 1, %s730_s9  }
 0x162   : > { %p1070_p13 = scmp.ne.s32.totalorder %s1055_s22, 0  ;;  %s362_s26 = scalar_lea.sflag [#allocation5], %s361_s18 }
 0x164   : > { %p517_p3 = pnand %p523_p12, %p1070_p13 }
 0x166   : > { %725 = dma.done.wait (!%p517_p3), %s362_s26, 128  }
 0x167   : > { %727 = vsyncadd (!%p517_p3), %s362_s26, 4294967168  ;;  %s19_s16 = sadd.s32 1, %s758_s16   ;;  %s1071_s12 = sld [smem:[#allocation12_spill]] }
 0x168   : > { %p16_p7 = scmp.ge.s32.totalorder %s19_s16, 14   ;;  %s1072_s14 = sld [smem:[#allocation13_spill]] }
 0x169   : > { %s1073_s29 = sld [smem:[#allocation14_spill]]  ;;  %s1074_s9 = smov %s734_s10 }
 0x16a   : > { %s1075_s10 = smov %s738_s11  ;;  %s1076_s11 = smov %s909_s7 }
 0x16b   : > { %s1077_s13 = smov %s754_s15  ;;  %18 = sbr.rel (!%p16_p7) target bundleno = 10 (0xa), region = 87 }
 0x16f   : > { %s1078_s15 = smov %s1073_s29 }
 0x172   :  { %367 = vsyncpa [#allocation4], 1 }
 0x173   :  { %369 = vsyncpa [#allocation4 + $0x1], 1 }
 0x174   :  { %370 = vsyncpa [#allocation7], 1 }
 0x175   :  { %372 = vsyncpa [#allocation7 + $0x1], 1 }
 0x176   :  { %373 = vsyncpa [#allocation5], 1 }
 0x177   :  { %375 = vsyncpa [#allocation5 + $0x1], 1 }

// kernel: optimized_mha_forward.5
= control target key start
LH: loop header
LB: loop body
LE: loop exit
PB: predicated region body
PF: predicated region fallthrough
CT: control target
= control target key end

     0   :  { %7 = vsyncpa [#allocation4], 0  ;;  %s873_s0 = inlined_call_operand.hbm [shape: bf16[4,16,8], index: 0, kind: input, shape index: {}]   ;;  %s874_s1 = inlined_call_operand.hbm [shape: bf16[4,8,32], index: 1, kind: input, shape index: {}]   ;;  %s875_s2 = inlined_call_operand.hbm [shape: f32[16,32], index: 2, kind: output, shape index: {}]  }
   0x1   :  { %9 = vsyncpa [#allocation4 + $0x1], 0 }
   0x2   :  { %10 = vsyncpa [#allocation7], 0 }
   0x3   :  { %12 = vsyncpa [#allocation7 + $0x1], 0 }
   0x4   :  { %13 = vsyncpa [#allocation5], 0  ;;  %s682_s9 = smov 0   ;;  %s684_s10 = smov 0  }
   0x5   :  { %s686_s11 = smov 0   ;;  %s688_s12 = smov 0  }
   0x6   :  { %s690_s13 = smov 0   ;;  %s692_s14 = smov 0  }
   0x7 LB: > { %s408_s15 = sadd.s32 4294967295, %s655_s14   ;;  %s31_s16 = sadd.s32 1, %s651_s13  ;;  %s655_s14 = sphi %s692_s14, %s19_s14   ;;  %s651_s13 = sphi %s690_s13, %s888_s13   ;;  %s647_s12 = sphi %s688_s12, %s887_s12   ;;  %s643_s11 = sphi %s686_s11, %s886_s11   ;;  %s639_s10 = sphi %s684_s10, %s885_s10   ;;  %s635_s9 = sphi %s682_s9, %s884_s9  }
   0x8   : > { %p32_p0 = scmp.ge.s32.totalorder %s31_s16, 4  ;;  %s47_s17 = sadd.s32 1, %s643_s11 }
   0x9   : > { %p54_p1 = scmp.ne.s32.totalorder %s643_s11, %s639_s10  ;;  %p55_p2 = scmp.eq.s32.totalorder %s655_s14, 0 }
   0xa   : > { %s890_s16 = smov (%p32_p0, %s31_s16), 0  ;;  %p60_p4 = scmp.ne.s32.totalorder %s639_s10, %s635_s9 }
   0xb   : > { %p718_p3 = por %p55_p2, %p54_p1  ;;  %s42_s19 = ssub.s32 %s651_s13, %s890_s16 }
   0xc   : > { %p61_p5 = scmp.eq.s32.totalorder %s408_s15, 0  ;;  %p45_p6 = scmp.eq.s32.totalorder %s42_s19, 0 }
   0xd   : > { %p451_p8 = scmp.lt.s32.totalorder %s655_s14, 4  ;;  %s736_s22 = sand.u32 1, %s643_s11  }
   0xe   : > { %p727_p7 = por %p61_p5, %p60_p4  ;;  %s427_s23 = sshll.u32 %s651_s13, 7 }
   0xf   : > { %s733_s21 = scalar_select %p45_p6, %s643_s11, %s47_s17  }
  0x10   : > { %s878_s20 = scalar_select %p727_p7, 1, 0 }
  0x11   : > { %s411_s24 = sshll.u32 %s736_s22, 3  ;;  %s743_s27 = scalar_lea.hbm %s873_s0, %s427_s23 }
  0x12   : > { %s144_s28 = scalar_lea.vmem [#allocation3], %s411_s24  ;;  %p747_p9 = pnand %p451_p8, %p718_p3 }
  0x13   : > { %s153_s29 = sshll.u32 %s144_s28, 4  ;;  %s141_s3 = scalar_lea.sflag [#allocation4], %s736_s22  ;;  %s751_s29 = int_to_ptr.vmem [resolvable:$true] %s153_s29 }
  0x14   : > { %s511_s4 = scalar_lea.hbm %s743_s27, 128  ;;  %p513_p11 = pneg %p747_p9 }
  0x15   : > { %p512_p10 = scmp.ne.s32.totalorder %s743_s27, %s511_s4  ;;  %s516_s7 = scalar_lea.hbm %s873_s0, 512 }
  0x16   : > { %p517_p0 = scmp.lt.u32.totalorder %s743_s27, %s873_s0  ;;  %p518_p1 = scmp.lt.u32.totalorder %s516_s7, %s511_s4 }
  0x17   : > { %p514_p12 = pnand %p513_p11, %p512_p10  ;;  %p520_p3 = scmp.lt.u32.totalorder %s511_s4, %s743_s27 }
  0x18   : > { %p519_p2 = por %p518_p1, %p517_p0 }
  0x19   : > { %p515_p13 = pneg %p514_p12 }
  0x1a   : > { %p521_p4 = por %p520_p3, %p519_p2 }
  0x1c   : > { %p522_p5 = pnand %p521_p4, %p515_p13 }
  0x1e   : > { %525 = shalt.err (!%p522_p5)
}
  0x1f   : > { %s526_s17 = scalar_lea.vmem %s751_s29, 128  ;;  %s657_s18 = smov [#allocation3]  }
  0x20   : > { %p527_p6 = scmp.ne.s32.totalorder %s751_s29, %s526_s17  ;;  %s531_s19 = sshll.u32 %s657_s18, 4  ;;  %s532_s19 = int_to_ptr.vmem [resolvable:$false] %s531_s19 }
  0x21   : > { %s533_s23 = scalar_lea.vmem %s532_s19, 256  ;;  %p534_p12 = scmp.lt.s32.totalorder %s751_s29, %s532_s19 }
  0x22   : > { %p529_p8 = pnand %p527_p6, %p513_p11  ;;  %p535_p0 = scmp.lt.s32.totalorder %s533_s23, %s526_s17 }
  0x24   : > { %p530_p10 = pneg %p529_p8  ;;  %p536_p1 = por %p535_p0, %p534_p12 }
  0x26   : > { %p537_p2 = pnand %p536_p1, %p530_p10 }
  0x28   : > { %540 = shalt.err (!%p537_p2)
}
  0x29   : > { %s658_s24 = smov 64   ;;  %s659_s25 = smov 4  }
  0x2a   : > { %447 = dma.hbm_to_vmem [thread:$0]  (!%p747_p9), %s743_s27, 128, %s751_s29, %s141_s3, %s658_s24, %s658_s24, %s659_s25  }
  0x2b   : > { %p416_p13 = scmp.ge.s32.totalorder %s655_s14, 1  ;;  %p180_p3 = scmp.lt.s32.totalorder %s655_s14, 5 }
  0x2c   : > { %s414_s26 = sshll.u32 %s736_s22, 2  ;;  %s415_s4 = sshll.u32 %s651_s13, 6 }
  0x2d   : > { %p784_p4 = pnand %p416_p13, %p180_p3  ;;  %s167_s5 = scalar_lea.vmem [#allocation6], %s414_s26 }
  0x2e   : > { %s175_s6 = sshll.u32 %s167_s5, 4  ;;  %s792_s9 = scalar_lea.hbm %s874_s1, %s415_s4  ;;  %s176_s6 = int_to_ptr.vmem [resolvable:$true] %s175_s6 }
  0x2f   : > { %s880_s28 = scalar_select %p784_p4, 1, 0 }
  0x30   : > { %s164_s27 = scalar_lea.sflag [#allocation7], %s736_s22  ;;  %s541_s29 = scalar_lea.hbm %s792_s9, 64 }
  0x31   : > { %p542_p5 = scmp.ne.s32.totalorder %s792_s9, %s541_s29  ;;  %s546_s18 = scalar_lea.hbm %s874_s1, 256 }
  0x32   : > { %p547_p10 = scmp.lt.u32.totalorder %s792_s9, %s874_s1  ;;  %p548_p12 = scmp.lt.u32.totalorder %s546_s18, %s541_s29 }
  0x33   : > { %p544_p6 = pnand %p542_p5, %p513_p11  ;;  %p550_p1 = scmp.lt.u32.totalorder %s541_s29, %s792_s9 }
  0x34   : > { %p549_p0 = por %p548_p12, %p547_p10 }
  0x35   : > { %p545_p8 = pneg %p544_p6 }
  0x36   : > { %p551_p2 = por %p550_p1, %p549_p0 }
  0x38   : > { %p552_p13 = pnand %p551_p2, %p545_p8 }
  0x3a   : > { %555 = shalt.err (!%p552_p13)
}
  0x3b   : > { %s556_s22 = scalar_lea.vmem %s176_s6, 64  ;;  %s660_s24 = smov [#allocation6]  }
  0x3c   : > { %p557_p3 = scmp.ne.s32.totalorder %s176_s6, %s556_s22  ;;  %s561_s25 = sshll.u32 %s660_s24, 4  ;;  %s562_s25 = int_to_ptr.vmem [resolvable:$false] %s561_s25 }
  0x3d   : > { %s563_s26 = scalar_lea.vmem %s562_s25, 128  ;;  %p564_p7 = scmp.lt.s32.totalorder %s176_s6, %s562_s25 }
  0x3e   : > { %p559_p5 = pnand %p557_p3, %p513_p11  ;;  %p565_p4 = scmp.lt.s32.totalorder %s563_s26, %s556_s22 }
  0x40   : > { %p560_p6 = pneg %p559_p5  ;;  %p566_p10 = por %p565_p4, %p564_p7 }
  0x42   : > { %p567_p12 = pnand %p566_p10, %p560_p6 }
  0x44   : > { %570 = shalt.err (!%p567_p12)
}
  0x45   : > { %450 = dma.hbm_to_vmem [thread:$0]  (!%p747_p9), %s792_s9, 64, %s176_s6, %s164_s27  }
  0x46   : > { %p881_p8 = scmp.ne.s32.totalorder %s880_s28, 0 }
  0x47   : > { %s186_s4 = sand.u32 (!%p881_p8), 1, %s639_s10   ;;  %p882_p11 = scmp.ne.s32.totalorder (!%p881_p8), %s878_s20, 0 }
  0x48   : > { %184 = sbr.rel (%p881_p8) target bundleno = 348 (0x15c), region = 28  ;;  %s417_s5 = sshll.u32 (!%p881_p8), %s186_s4, 3 }
  0x49   : > { %s187_s7 = scalar_lea.sflag (!%p881_p8), [#allocation4], %s186_s4  ;;  %s190_s8 = scalar_lea.vmem (!%p881_p8), [#allocation3], %s417_s5 }
  0x4f   : > { %622 = dma.done.wait (%p882_p11), %s187_s7, 128  }
  0x50   : > { %624 = vsyncadd (%p882_p11), %s187_s7, 4294967168  ;;  %s418_s29 = sshll.u32 %s186_s4, 2  ;;  %s196_s3 = scalar_lea.sflag [#allocation7], %s186_s4 }
  0x51   : > { %s199_s30 = scalar_lea.vmem [#allocation6], %s418_s29 }
  0x52   : > { %626 = dma.done.wait (%p882_p11), %s196_s3, 64  }
  0x53   : > { %628 = vsyncadd (%p882_p11), %s196_s3, 4294967232  ;;  %p419_p7 = scmp.ne.s32.totalorder %s647_s12, 0 }
  0x54   : > { %vm227_vm0 = vcmask (!%p419_p7), 261120   ;;  %v661_v0 = vmov (!%p419_p7), 0.0  }
  0x55   : > { %226 = sbr.rel (%p419_p7) target bundleno = 92 (0x5c), region = 40  ;;  %228 = vst.msk [vmem:[#allocation2] sm:$0xff] (!%p419_p7), %vm227_vm0, %v661_v0  ;;  %229 = vst.msk [vmem:[#allocation2 + $0x8] sm:$0xff] (!%p419_p7), %vm227_vm0, %v661_v0 }
  0x5c PF: > { %v234_v1 = vld [vmem:[%s199_s30] sm:$0xf]  ;;  %vm244_vm1 = vcmask 1043456   ;;  %v662_v2 = vmov 0.0   ;;  %vm663_vm2 = vmmov 0   ;;  %v510_v4 = vld [vmem:[%s190_s8] sm:$0xff]  }
  0x5d   : > { %430 = vmatprep.subr.bf16.mxu0 %v662_v2  ;;  %v246_v3 = vsel %vm244_vm1, %v234_v1, 0  ;;  %432 = vmatprep.mubr.msk.bf16.mxu0 %vm663_vm2, %v662_v2  ;;  %vm240_vm3 = vcmask 64512   ;;  %v230_v5 = vld [vmem:[#allocation2] sm:$0xff]  ;;  %vm291_vm4 = vcmask 261120   ;;  %v231_v7 = vld [vmem:[#allocation2 + $0x8] sm:$0xff]  ;;  %p422_p9 = scmp.ne.s32.totalorder %s647_s12, 3 }
  0x5e   : > { %431 = vmatpush3.bf16.msra.mxu0 %v246_v3 }
  0x61   : > { %433 = vmatmul.mubr.msk.bf16.vlgmr.msra.gmra.mrb[0].mxu0 %vm240_vm3, %v510_v4 }
 0x133   : > { %297 = sbr.rel (%p422_p9) target bundleno = 322 (0x142), region = 44 }
 0x134   : > { %v282_v6 = vpop.f32.mrb[0].mxu0 }
 0x135   : > { %v289_v8 = vadd.f32 %v282_v6, %v230_v5  ;;  %v434_v9 = vpop.f32.mrb[1].mxu0 }
 0x136   : > { %v285_v10 = vpop.f32.mrb[2].mxu0 }
 0x137   : > { %292 = vst.msk [vmem:[#allocation2] sm:$0xff] %vm291_vm4, %v289_v8  ;;  %v290_v11 = vadd.f32 %v285_v10, %v231_v7  ;;  %v435_v12 = vpop.f32.mrb[3].mxu0 }
 0x139   : > { %293 = vst.msk [vmem:[#allocation2 + $0x8] sm:$0xff] %vm291_vm4, %v290_v11 }
 0x13e   : > { %v298_v13 = vld [vmem:[#allocation2] sm:$0xff] }
 0x13f   : > { %300 = vst.msk [vmem:[#allocation8] sm:$0xff] %vm291_vm4, %v298_v13 }
 0x140   : > { %v299_v14 = vld [vmem:[#allocation2 + $0x8] sm:$0xff] }
 0x141   : > { %301 = vst.msk [vmem:[#allocation8 + $0x8] sm:$0xff] %vm291_vm4, %v299_v14 }
 0x142 PF: > { %p829_p4 = scmp.eq.s32.totalorder %s408_s15, 3  ;;  %s664_s28 = smov [#allocation8]  }
 0x143   : > { %s312_s6 = sshll.u32 %s664_s28, 4  ;;  %s313_s6 = int_to_ptr.vmem [resolvable:$true] %s312_s6 }
 0x144   : > { %s571_s9 = scalar_lea.vmem %s313_s6, 256  ;;  %p578_p13 = scmp.lt.s32.totalorder %s313_s6, %s313_s6 }
 0x145   : > { %p572_p0 = scmp.ne.s32.totalorder %s313_s6, %s571_s9  ;;  %p579_p3 = scmp.lt.s32.totalorder %s571_s9, %s571_s9 }
 0x147   : > { %p573_p1 = pnand %p572_p0, %p829_p4  ;;  %p580_p5 = por %p579_p3, %p578_p13 }
 0x149   : > { %p574_p2 = pneg %p573_p1 }
 0x14b   : > { %p581_p6 = pnand %p580_p5, %p574_p2 }
 0x14d   : > { %584 = shalt.err (!%p581_p6)
}
 0x14e   : > { %s585_s15 = scalar_lea.hbm %s875_s2, 256 }
 0x14f   : > { %p586_p10 = scmp.ne.s32.totalorder %s875_s2, %s585_s15  ;;  %p591_p11 = scmp.lt.u32.totalorder %s585_s15, %s875_s2 }
 0x151   : > { %p587_p12 = pnand %p586_p10, %p829_p4 }
 0x153   : > { %p588_p8 = pneg %p587_p12 }
 0x155   : > { %p593_p7 = pnand %p591_p11, %p588_p8 }
 0x157   : > { %596 = shalt.err (!%p593_p7)
}
 0x158   : > { %s665_s22 = smov 128   ;;  %s666_s24 = smov 8  }
 0x159   : > { %441 = dma.vmem_to_hbm [thread:$0]  (%p829_p4), %s313_s6, 256, %s875_s2, [#allocation5], %s665_s22, %s665_s22, %s666_s24  }
 0x15a   : > { %630 = dma.done.wait (%p829_p4), [#allocation5], 256  }
 0x15b   : > { %632 = vsyncadd (%p829_p4), [#allocation5], 4294967040 }
 0x15c PF: > { %s19_s14 = sadd.s32 1, %s655_s14   ;;  %s884_s9 = smov %s639_s10 }
 0x15d   : > { %p16_p9 = scmp.ge.s32.totalorder %s19_s14, 6   ;;  %s885_s10 = smov %s643_s11 }
 0x15e   : > { %s886_s11 = smov %s733_s21  ;;  %s887_s12 = smov %s651_s13 }
 0x15f   : > { %s888_s13 = smov %s890_s16  ;;  %18 = sbr.rel (!%p16_p9) target bundleno = 7 (0x7), region = 87 }
 0x166   :  { %328 = vsyncpa [#allocation4], 1 }
 0x167   :  { %330 = vsyncpa [#allocation4 + $0x1], 1 }
 0x168   :  { %331 = vsyncpa [#allocation7], 1 }
 0x169   :  { %333 = vsyncpa [#allocation7 + $0x1], 1 }
 0x16a   :  { %334 = vsyncpa [#allocation5], 1 }
 0x16b   :  { %336 = vsyncpa [#allocation5 + $0x1], 1 }

// kernel: optimized_mha_forward.4
= control target key start
LH: loop header
LB: loop body
LE: loop exit
PB: predicated region body
PF: predicated region fallthrough
CT: control target
= control target key end

     0   :  { %s2753_s0 = inlined_call_operand.hbm [shape: bf16[3,4,2,8,8], index: 0, kind: input, shape index: {}, may-alias: {0,1,2}]   ;;  %s2754_s1 = inlined_call_operand.hbm [shape: bf16[3,4,2,8,8], index: 1, kind: input, shape index: {}, may-alias: {0,1,2}]   ;;  %s2755_s2 = inlined_call_operand.hbm [shape: bf16[3,4,2,8,8], index: 2, kind: input, shape index: {}, may-alias: {0,1,2}]   ;;  %s2756_s3 = inlined_call_operand.hbm [shape: f32[2,8,8], index: 3, kind: input, shape index: {}]   ;;  %s2757_s4 = inlined_call_operand.hbm [shape: f32[2,8,8], index: 4, kind: input, shape index: {}]   ;;  %s2758_s5 = inlined_call_operand.hbm [shape: f32[2,8,8], index: 5, kind: input, shape index: {}]   ;;  %s2759_s6 = inlined_call_operand.hbm [shape: f32[2,8,8], index: 6, kind: input, shape index: {}]   ;;  %s2760_s7 = inlined_call_operand.hbm [shape: bf16[4,2,8,8], index: 7, kind: output, shape index: {}]  }
   0x1   :  { %2780 = sst [smem:[#allocation30_spill]] %s2754_s1 }
   0x2   :  { %2781 = sst [smem:[#allocation31_spill]] %s2756_s3 }
   0x3   :  { %2782 = sst [smem:[#allocation32_spill]] %s2758_s5 }
   0x4   :  { %2783 = sst [smem:[#allocation33_spill]] %s2760_s7 }
   0x5   :  { %12 = vsyncpa [#allocation6], 0 }
   0x6   :  { %14 = vsyncpa [#allocation6 + $0x1], 0 }
   0x7   :  { %15 = vsyncpa [#allocation9], 0 }
   0x8   :  { %17 = vsyncpa [#allocation9 + $0x1], 0 }
   0x9   :  { %18 = vsyncpa [#allocation12], 0 }
   0xa   :  { %20 = vsyncpa [#allocation12 + $0x1], 0 }
   0xb   :  { %21 = vsyncpa [#allocation15], 0 }
   0xc   :  { %23 = vsyncpa [#allocation15 + $0x1], 0 }
   0xd   :  { %24 = vsyncpa [#allocation7], 0 }
   0xe   :  { %26 = vsyncpa [#allocation7 + $0x1], 0  ;;  %s2142_s24 = smov 0   ;;  %s2144_s25 = smov 0  }
   0xf   :  { %s2146_s26 = smov 0   ;;  %s2148_s27 = smov 0  }
  0x10   :  { %s2150_s28 = smov 0   ;;  %s2152_s29 = smov 0  }
  0x11 LB: > { %2784 = sst [smem:[#allocation23_spill]] %s2061_s24  ;;  %s2173_s30 = sadd.s32 4294967295, %s2081_s29   ;;  %s2081_s29 = sphi %s2152_s29, %s32_s29   ;;  %s2077_s28 = sphi %s2150_s28, %s2829_s28   ;;  %s2073_s27 = sphi %s2148_s27, %s2828_s27   ;;  %s2069_s26 = sphi %s2146_s26, %s2824_s26   ;;  %s2065_s25 = sphi %s2144_s25, %s2827_s25   ;;  %s2061_s24 = sphi %s2142_s24, %s2826_s24  }
  0x12   : > { %2785 = sst [smem:[#allocation24_spill]] %s2069_s26  ;;  %s1506_s8 = sadd.s32 4294967294, %s2081_s29  }
  0x13   : > { %2786 = sst [smem:[#allocation25_spill]] %s2073_s27  ;;  %s51_s9 = sadd.s32 1, %s2077_s28 }
  0x14   : > { %s60_s10 = sadd.s32 1, %s2069_s26  ;;  %p53_p0 = scmp.ge.s32.totalorder %s51_s9, 2 }
  0x15   : > { %p67_p1 = scmp.ne.s32.totalorder %s2069_s26, %s2065_s25  ;;  %p68_p2 = scmp.eq.s32.totalorder %s2081_s29, 0 }
  0x16   : > { %p73_p3 = scmp.ne.s32.totalorder %s2065_s25, %s2061_s24  ;;  %s2831_s9 = smov (%p53_p0, %s51_s9), 0 }
  0x17   : > { %2787 = sst [smem:[#allocation26_spill]] %s2831_s9  ;;  %p2185_p4 = por %p68_p2, %p67_p1 }
  0x18   : > { %p74_p5 = scmp.eq.s32.totalorder %s2173_s30, 0  ;;  %s55_s12 = ssub.s32 %s2077_s28, %s2831_s9 }
  0x19   : > { %p267_p6 = scmp.eq.s32.totalorder %s2173_s30, 1  ;;  %p58_p7 = scmp.eq.s32.totalorder %s55_s12, 0 }
  0x1a   : > { %p2193_p8 = por %p74_p5, %p73_p3  ;;  %p273_p10 = scmp.eq.s32.totalorder %s1506_s8, 1 }
  0x1b   : > { %p2197_p9 = por %p267_p6, %p67_p1  ;;  %p1668_p13 = scmp.lt.s32.totalorder %s2081_s29, 2 }
  0x1c   : > { %s2789_s13 = scalar_select %p2193_p8, 1, 0 }
  0x1d   : > { %s2790_s14 = scalar_select %p2197_p9, 1, 0 }
  0x1e   : > { %s2202_s15 = scalar_select %p58_p7, %s2069_s26, %s60_s10  }
  0x1f   : > { %2791 = sst [smem:[#allocation27_spill]] %s2790_s14  ;;  %p2204_p11 = por %p273_p10, %p73_p3 }
  0x20   : > { %2792 = sst [smem:[#allocation28_spill]] %s2202_s15  ;;  %s2211_s17 = sand.u32 1, %s2069_s26  }
  0x21   : > { %s2793_s16 = scalar_select %p2204_p11, 1, 0 }
  0x22   : > { %s2214_s18 = sshll.u32 %s2211_s17, 4  ;;  %s2217_s19 = sshll.u32 %s2077_s28, 6 }
  0x23   : > { %2794 = sst [smem:[#allocation29_spill]] %s2793_s16  ;;  %p2221_p0 = pnand %p1668_p13, %p2185_p4 }
  0x24   : > { %s2226_s21 = sand.u32 1, %s2081_s29   ;;  %s2796_s1 = sld [smem:[#allocation30_spill]] }
  0x25   : > { %s2795_s20 = scalar_select %p2221_p0, 1, 0 }
  0x26   : > { %s318_s10 = scalar_lea.vmem [#allocation8], %s2214_s18  ;;  %s2770_s11 = scalar_lea.sflag [#allocation9], %s2226_s21 }
  0x27   : > { %s326_s12 = sshll.u32 %s318_s10, 4  ;;  %p2241_p2 = pneg %p2221_p0  ;;  %s2235_s12 = int_to_ptr.vmem [resolvable:$true] %s326_s12 }
  0x2a   : > { %s1329_s8 = scalar_lea.hbm %s2796_s1, %s2217_s19  ;;  %s1780_s10 = scalar_lea.hbm %s2796_s1, 1536 }
  0x2b   : > { %s2233_s9 = scalar_lea.hbm %s1329_s8, 512  ;;  %s1805_s15 = scalar_lea.hbm %s1329_s8, 768 }
  0x2c   : > { %p1776_p1 = scmp.ne.s32.totalorder %s2233_s9, %s1805_s15  ;;  %p1781_p5 = scmp.lt.u32.totalorder %s2233_s9, %s2796_s1 }
  0x2d   : > { %p1782_p6 = scmp.lt.u32.totalorder %s1780_s10, %s1805_s15  ;;  %p1784_p10 = scmp.lt.u32.totalorder %s1805_s15, %s2233_s9 }
  0x2e   : > { %p1778_p3 = pnand %p2241_p2, %p1776_p1 }
  0x2f   : > { %p1783_p7 = por %p1782_p6, %p1781_p5 }
  0x30   : > { %p1779_p4 = pneg %p1778_p3 }
  0x31   : > { %p1785_p13 = por %p1784_p10, %p1783_p7 }
  0x33   : > { %p1786_p12 = pnand %p1785_p13, %p1779_p4 }
  0x35   : > { %1789 = shalt.err (!%p1786_p12)
}
  0x36   : > { %s1790_s8 = scalar_lea.vmem %s2235_s12, 256  ;;  %s2083_s22 = smov [#allocation8]  }
  0x37   : > { %p1791_p1 = scmp.ne.s32.totalorder %s2235_s12, %s1790_s8  ;;  %s1795_s23 = sshll.u32 %s2083_s22, 4  ;;  %s1796_s23 = int_to_ptr.vmem [resolvable:$false] %s1795_s23 }
  0x38   : > { %s1797_s24 = scalar_lea.vmem %s1796_s23, 512  ;;  %p1798_p9 = scmp.lt.s32.totalorder %s2235_s12, %s1796_s23 }
  0x39   : > { %p1793_p3 = pnand %p1791_p1, %p2241_p2  ;;  %p1799_p8 = scmp.lt.s32.totalorder %s1797_s24, %s1790_s8 }
  0x3b   : > { %p1794_p11 = pneg %p1793_p3  ;;  %p1800_p5 = por %p1799_p8, %p1798_p9 }
  0x3d   : > { %p1801_p6 = pnand %p1800_p5, %p1794_p11 }
  0x3f   : > { %1804 = shalt.err (!%p1801_p6)
}
  0x40   : > { %s2771_s15 = smov 128   ;;  %s2773_s16 = smov 64  }
  0x41   : > { %s2775_s10 = smov 4   ;;  %p1523_p8 = scmp.ge.s32.totalorder %s2081_s29, 1 }
  0x42   : > { %1648 = dma.hbm_to_vmem [thread:$0]  (!%p2221_p0), %s2233_s9, 256, %s2235_s12, %s2770_s11, %s2771_s15, %s2773_s16, %s2775_s10  }
  0x43   : > { %p432_p9 = scmp.lt.s32.totalorder %s2081_s29, 3  ;;  %s2272_s8 = sshll.u32 %s2211_s17, 3 }
  0x44   : > { %s2279_s23 = sshll.u32 %s2077_s28, 7  ;;  %s362_s24 = scalar_lea.vmem [#allocation11], %s2272_s8 }
  0x45   : > { %p2274_p11 = pnand %p1523_p8, %p432_p9  ;;  %s370_s1 = sshll.u32 %s362_s24, 4  ;;  %s371_s1 = int_to_ptr.vmem [resolvable:$true] %s370_s1 }
  0x46   : > { %s2799_s3 = sld [smem:[#allocation31_spill]] }
  0x47   : > { %s2798_s22 = scalar_select %p2274_p11, 1, 0 }
  0x4c   : > { %s2286_s27 = scalar_lea.hbm %s2799_s3, %s2279_s23  ;;  %s1811_s24 = scalar_lea.hbm %s2799_s3, 256 }
  0x4d   : > { %s1806_s12 = scalar_lea.hbm %s2286_s27, 128  ;;  %p1812_p10 = scmp.lt.u32.totalorder %s2286_s27, %s2799_s3 }
  0x4e   : > { %p1807_p12 = scmp.ne.s32.totalorder %s2286_s27, %s1806_s12  ;;  %p1813_p13 = scmp.lt.u32.totalorder %s1811_s24, %s1806_s12 }
  0x4f   : > { %p1815_p3 = scmp.lt.u32.totalorder %s1806_s12, %s2286_s27 }
  0x50   : > { %p1809_p4 = pnand %p1807_p12, %p2241_p2  ;;  %p1814_p1 = por %p1813_p13, %p1812_p10 }
  0x52   : > { %p1810_p7 = pneg %p1809_p4  ;;  %p1816_p5 = por %p1815_p3, %p1814_p1 }
  0x54   : > { %p1817_p6 = pnand %p1816_p5, %p1810_p7 }
  0x56   : > { %1820 = shalt.err (!%p1817_p6)
}
  0x57   : > { %s1821_s7 = scalar_lea.vmem %s371_s1, 128  ;;  %s2087_s14 = smov [#allocation11]  }
  0x58   : > { %p1822_p8 = scmp.ne.s32.totalorder %s371_s1, %s1821_s7  ;;  %s1826_s9 = sshll.u32 %s2087_s14, 4  ;;  %s1827_s9 = int_to_ptr.vmem [resolvable:$false] %s1826_s9 }
  0x59   : > { %s1828_s11 = scalar_lea.vmem %s1827_s9, 256  ;;  %p1829_p4 = scmp.lt.s32.totalorder %s371_s1, %s1827_s9 }
  0x5a   : > { %p1824_p9 = pnand %p1822_p8, %p2241_p2  ;;  %p1830_p11 = scmp.lt.s32.totalorder %s1828_s11, %s1821_s7 }
  0x5c   : > { %p1825_p12 = pneg %p1824_p9  ;;  %p1831_p0 = por %p1830_p11, %p1829_p4 }
  0x5e   : > { %p1832_p10 = pnand %p1831_p0, %p1825_p12 }
  0x60   : > { %1835 = shalt.err (!%p1832_p10)
}
  0x61   : > { %p2800_p13 = scmp.ne.s32.totalorder %s2795_s20, 0  ;;  %s2801_s15 = scalar_lea.sflag [#allocation12], %s2226_s21 }
  0x62   : > { %s2802_s5 = sld [smem:[#allocation32_spill]]  ;;  %s400_s9 = scalar_lea.vmem [#allocation14], %s2272_s8 }
  0x63   : > { %1654 = dma.hbm_to_vmem [thread:$0]  (!%p2800_p13), %s2286_s27, 128, %s371_s1, %s2801_s15  }
  0x64   : > { %s408_s24 = sshll.u32 %s400_s9, 4  ;;  %s409_s24 = int_to_ptr.vmem [resolvable:$true] %s408_s24 }
  0x68   : > { %s2312_s12 = scalar_lea.hbm %s2802_s5, %s2279_s23  ;;  %s1841_s27 = scalar_lea.hbm %s2802_s5, 256 }
  0x69   : > { %s1836_s14 = scalar_lea.hbm %s2312_s12, 128  ;;  %p1842_p1 = scmp.lt.u32.totalorder %s2312_s12, %s2802_s5 }
  0x6a   : > { %p1837_p0 = scmp.ne.s32.totalorder %s2312_s12, %s1836_s14  ;;  %p1843_p3 = scmp.lt.u32.totalorder %s1841_s27, %s1836_s14 }
  0x6b   : > { %p1845_p6 = scmp.lt.u32.totalorder %s1836_s14, %s2312_s12 }
  0x6c   : > { %p1839_p11 = pnand %p1837_p0, %p2241_p2  ;;  %p1844_p5 = por %p1843_p3, %p1842_p1 }
  0x6e   : > { %p1840_p7 = pneg %p1839_p11  ;;  %p1846_p8 = por %p1845_p6, %p1844_p5 }
  0x70   : > { %p1847_p9 = pnand %p1846_p8, %p1840_p7 }
  0x72   : > { %1850 = shalt.err (!%p1847_p9)
}
  0x73   : > { %s1851_s10 = scalar_lea.vmem %s409_s24, 128  ;;  %s2088_s9 = smov [#allocation14]  }
  0x74   : > { %p1852_p12 = scmp.ne.s32.totalorder %s409_s24, %s1851_s10  ;;  %s1856_s7 = sshll.u32 %s2088_s9, 4  ;;  %s1857_s7 = int_to_ptr.vmem [resolvable:$false] %s1856_s7 }
  0x75   : > { %s1858_s11 = scalar_lea.vmem %s1857_s7, 256  ;;  %p1859_p0 = scmp.lt.s32.totalorder %s409_s24, %s1857_s7 }
  0x76   : > { %p1854_p4 = pnand %p1852_p12, %p2241_p2  ;;  %p1860_p11 = scmp.lt.s32.totalorder %s1858_s11, %s1851_s10 }
  0x78   : > { %p1855_p10 = pneg %p1854_p4  ;;  %p1861_p13 = por %p1860_p11, %p1859_p0 }
  0x7a   : > { %p1862_p1 = pnand %p1861_p13, %p1855_p10 }
  0x7c   : > { %1865 = shalt.err (!%p1862_p1)
}
  0x7d   : > { %p2803_p3 = scmp.ne.s32.totalorder %s2795_s20, 0  ;;  %s2804_s14 = scalar_lea.sflag [#allocation15], %s2226_s21 }
  0x7e   : > { %s2339_s15 = scalar_lea.hbm %s2753_s0, %s2217_s19  ;;  %s297_s7 = scalar_lea.vmem [#allocation5], %s2214_s18 }
  0x7f   : > { %1660 = dma.hbm_to_vmem [thread:$0]  (!%p2803_p3), %s2312_s12, 128, %s409_s24, %s2804_s14  }
  0x80   : > { %s304_s16 = sshll.u32 %s297_s7, 4  ;;  %s2348_s11 = scalar_lea.hbm %s2755_s2, %s2217_s19  ;;  %s2342_s16 = int_to_ptr.vmem [resolvable:$true] %s304_s16 }
  0x81   : > { %s294_s3 = scalar_lea.sflag [#allocation6], %s2211_s17  ;;  %s1866_s12 = scalar_lea.hbm %s2339_s15, 256 }
  0x82   : > { %p1867_p13 = scmp.ne.s32.totalorder %s2339_s15, %s1866_s12  ;;  %s1871_s1 = scalar_lea.hbm %s2753_s0, 1536 }
  0x83   : > { %p1872_p6 = scmp.lt.u32.totalorder %s2339_s15, %s2753_s0  ;;  %p1873_p8 = scmp.lt.u32.totalorder %s1871_s1, %s1866_s12 }
  0x84   : > { %p1869_p7 = pnand %p1867_p13, %p2241_p2  ;;  %p1875_p12 = scmp.lt.u32.totalorder %s1866_s12, %s2339_s15 }
  0x85   : > { %p1874_p9 = por %p1873_p8, %p1872_p6 }
  0x86   : > { %p1870_p5 = pneg %p1869_p7 }
  0x87   : > { %p1876_p4 = por %p1875_p12, %p1874_p9 }
  0x89   : > { %p1877_p10 = pnand %p1876_p4, %p1870_p5 }
  0x8b   : > { %1880 = shalt.err (!%p1877_p10)
}
  0x8c   : > { %s1881_s19 = scalar_lea.vmem %s2342_s16, 256  ;;  %s2089_s7 = smov [#allocation5]  }
  0x8d   : > { %p1882_p0 = scmp.ne.s32.totalorder %s2342_s16, %s1881_s19  ;;  %s1886_s10 = sshll.u32 %s2089_s7, 4  ;;  %s1887_s10 = int_to_ptr.vmem [resolvable:$false] %s1886_s10 }
  0x8e   : > { %s1888_s5 = scalar_lea.vmem %s1887_s10, 512  ;;  %p1889_p13 = scmp.lt.s32.totalorder %s2342_s16, %s1887_s10 }
  0x8f   : > { %p1884_p11 = pnand %p1882_p0, %p2241_p2  ;;  %p1890_p7 = scmp.lt.s32.totalorder %s1888_s5, %s1881_s19 }
  0x91   : > { %p1885_p1 = pneg %p1884_p11  ;;  %p1891_p6 = por %p1890_p7, %p1889_p13 }
  0x93   : > { %p1892_p8 = pnand %p1891_p6, %p1885_p1 }
  0x95   : > { %1895 = shalt.err (!%p1892_p8)
}
  0x96   : > { %s2805_s9 = smov 4   ;;  %s2806_s12 = smov 64  }
  0x97   : > { %s2807_s24 = smov 128   ;;  %s2378_s14 = scalar_lea.hbm %s2348_s11, 1024 }
  0x98   : > { %1645 = dma.hbm_to_vmem [thread:$0]  (!%p2803_p3), %s2339_s15, 256, %s2342_s16, %s294_s3, %s2807_s24, %s2806_s12, %s2805_s9  }
  0x99   : > { %s340_s1 = scalar_lea.vmem [#allocation10], %s2214_s18  ;;  %s1926_s19 = scalar_lea.hbm %s2348_s11, 1280 }
  0x9a   : > { %s348_s27 = sshll.u32 %s340_s1, 4  ;;  %p1897_p5 = scmp.ne.s32.totalorder %s2378_s14, %s1926_s19  ;;  %s2381_s27 = int_to_ptr.vmem [resolvable:$true] %s348_s27 }
  0x9b   : > { %s1901_s10 = scalar_lea.hbm %s2755_s2, 1536  ;;  %p1902_p4 = scmp.lt.u32.totalorder %s2378_s14, %s2755_s2 }
  0x9c   : > { %p1899_p9 = pnand %p1897_p5, %p2241_p2  ;;  %p1903_p10 = scmp.lt.u32.totalorder %s1901_s10, %s1926_s19 }
  0x9d   : > { %p1905_p11 = scmp.lt.u32.totalorder %s1926_s19, %s2378_s14 }
  0x9e   : > { %p1900_p12 = pneg %p1899_p9  ;;  %p1904_p0 = por %p1903_p10, %p1902_p4 }
  0xa0   : > { %p1906_p1 = por %p1905_p11, %p1904_p0 }
  0xa2   : > { %p1907_p13 = pnand %p1906_p1, %p1900_p12 }
  0xa4   : > { %1910 = shalt.err (!%p1907_p13)
}
  0xa5   : > { %s1911_s18 = scalar_lea.vmem %s2381_s27, 256  ;;  %s2090_s15 = smov [#allocation10]  }
  0xa6   : > { %p1912_p7 = scmp.ne.s32.totalorder %s2381_s27, %s1911_s18  ;;  %s1916_s16 = sshll.u32 %s2090_s15, 4  ;;  %s1917_s16 = int_to_ptr.vmem [resolvable:$false] %s1916_s16 }
  0xa7   : > { %s1918_s11 = scalar_lea.vmem %s1917_s16, 512  ;;  %p1919_p5 = scmp.lt.s32.totalorder %s2381_s27, %s1917_s16 }
  0xa8   : > { %p1914_p6 = pnand %p1912_p7, %p2241_p2  ;;  %p1920_p9 = scmp.lt.s32.totalorder %s1918_s11, %s1911_s18 }
  0xaa   : > { %p1915_p8 = pneg %p1914_p6  ;;  %p1921_p4 = por %p1920_p9, %p1919_p5 }
  0xac   : > { %p1922_p10 = pnand %p1921_p4, %p1915_p8 }
  0xae   : > { %1925 = shalt.err (!%p1922_p10)
}
  0xaf   : > { %s2808_s1 = scalar_lea.sflag [#allocation9], %s2226_s21  ;;  %s2413_s7 = scalar_lea.hbm %s2757_s4, %s2279_s23 }
  0xb0   : > { %1651 = dma.hbm_to_vmem [thread:$0]  (!%p2803_p3), %s2378_s14, 256, %s2381_s27, %s2808_s1, %s2807_s24, %s2806_s12, %s2805_s9  }
  0xb1   : > { %s381_s10 = scalar_lea.vmem [#allocation13], %s2272_s8  ;;  %s1927_s3 = scalar_lea.hbm %s2413_s7, 128 }
  0xb2   : > { %s389_s5 = sshll.u32 %s381_s10, 4  ;;  %p1928_p12 = scmp.ne.s32.totalorder %s2413_s7, %s1927_s3  ;;  %s390_s5 = int_to_ptr.vmem [resolvable:$true] %s389_s5 }
  0xb3   : > { %s1932_s9 = scalar_lea.hbm %s2757_s4, 256  ;;  %p1933_p1 = scmp.lt.u32.totalorder %s2413_s7, %s2757_s4 }
  0xb4   : > { %p1930_p0 = pnand %p1928_p12, %p2241_p2  ;;  %p1934_p13 = scmp.lt.u32.totalorder %s1932_s9, %s1927_s3 }
  0xb5   : > { %p1936_p6 = scmp.lt.u32.totalorder %s1927_s3, %s2413_s7 }
  0xb6   : > { %p1931_p11 = pneg %p1930_p0  ;;  %p1935_p7 = por %p1934_p13, %p1933_p1 }
  0xb8   : > { %p1937_p8 = por %p1936_p6, %p1935_p7 }
  0xba   : > { %p1938_p5 = pnand %p1937_p8, %p1931_p11 }
  0xbc   : > { %1941 = shalt.err (!%p1938_p5)
}
  0xbd   : > { %s1942_s14 = scalar_lea.vmem %s390_s5, 128  ;;  %s2091_s27 = smov [#allocation13]  }
  0xbe   : > { %p1943_p9 = scmp.ne.s32.totalorder %s390_s5, %s1942_s14  ;;  %s1947_s16 = sshll.u32 %s2091_s27, 4  ;;  %s1948_s16 = int_to_ptr.vmem [resolvable:$false] %s1947_s16 }
  0xbf   : > { %s1949_s11 = scalar_lea.vmem %s1948_s16, 256  ;;  %p1950_p12 = scmp.lt.s32.totalorder %s390_s5, %s1948_s16 }
  0xc0   : > { %p1945_p4 = pnand %p1943_p9, %p2241_p2  ;;  %p1951_p0 = scmp.lt.s32.totalorder %s1949_s11, %s1942_s14 }
  0xc2   : > { %p1946_p10 = pneg %p1945_p4  ;;  %p1952_p3 = por %p1951_p0, %p1950_p12 }
  0xc4   : > { %p1953_p1 = pnand %p1952_p3, %p1946_p10 }
  0xc6   : > { %1956 = shalt.err (!%p1953_p1)
}
  0xc7   : > { %p2809_p13 = scmp.ne.s32.totalorder %s2795_s20, 0  ;;  %s2810_s1 = scalar_lea.sflag [#allocation12], %s2226_s21 }
  0xc8   : > { %s2439_s10 = scalar_lea.hbm %s2759_s6, %s2279_s23  ;;  %s419_s3 = scalar_lea.vmem [#allocation16], %s2272_s8 }
  0xc9   : > { %1657 = dma.hbm_to_vmem [thread:$0]  (!%p2809_p13), %s2413_s7, 128, %s390_s5, %s2810_s1  }
  0xca   : > { %s427_s18 = sshll.u32 %s419_s3, 4  ;;  %s1957_s15 = scalar_lea.hbm %s2439_s10, 128  ;;  %s428_s18 = int_to_ptr.vmem [resolvable:$true] %s427_s18 }
  0xcb   : > { %p1958_p3 = scmp.ne.s32.totalorder %s2439_s10, %s1957_s15  ;;  %s1962_s7 = scalar_lea.hbm %s2759_s6, 256 }
  0xcc   : > { %p1963_p6 = scmp.lt.u32.totalorder %s2439_s10, %s2759_s6  ;;  %p1964_p8 = scmp.lt.u32.totalorder %s1962_s7, %s1957_s15 }
  0xcd   : > { %p1960_p11 = pnand %p1958_p3, %p2241_p2  ;;  %p1966_p9 = scmp.lt.u32.totalorder %s1957_s15, %s2439_s10 }
  0xce   : > { %p1965_p5 = por %p1964_p8, %p1963_p6 }
  0xcf   : > { %p1961_p7 = pneg %p1960_p11 }
  0xd0   : > { %p1967_p4 = por %p1966_p9, %p1965_p5 }
  0xd2   : > { %p1968_p10 = pnand %p1967_p4, %p1961_p7 }
  0xd4   : > { %1971 = shalt.err (!%p1968_p10)
}
  0xd5   : > { %s1972_s8 = scalar_lea.vmem %s428_s18, 128  ;;  %s2092_s23 = smov [#allocation16]  }
  0xd6   : > { %p1973_p12 = scmp.ne.s32.totalorder %s428_s18, %s1972_s8  ;;  %s1977_s14 = sshll.u32 %s2092_s23, 4  ;;  %s1978_s14 = int_to_ptr.vmem [resolvable:$false] %s1977_s14 }
  0xd7   : > { %s1979_s27 = scalar_lea.vmem %s1978_s14, 256  ;;  %p1980_p3 = scmp.lt.s32.totalorder %s428_s18, %s1978_s14 }
  0xd8   : > { %p1975_p0 = pnand %p1973_p12, %p2241_p2  ;;  %p1981_p11 = scmp.lt.s32.totalorder %s1979_s27, %s1972_s8 }
  0xda   : > { %p1976_p1 = pneg %p1975_p0  ;;  %p1982_p13 = por %p1981_p11, %p1980_p3 }
  0xdc   : > { %p1983_p6 = pnand %p1982_p13, %p1976_p1 }
  0xde   : > { %1986 = shalt.err (!%p1983_p6)
}
  0xdf   : > { %p2811_p8 = scmp.ne.s32.totalorder %s2795_s20, 0  ;;  %s2812_s16 = scalar_lea.sflag [#allocation15], %s2226_s21 }
  0xe0   : > { %p2813_p7 = scmp.ne.s32.totalorder %s2798_s22, 0 }
  0xe1   : > { %1663 = dma.hbm_to_vmem [thread:$0]  (!%p2811_p8), %s2439_s10, 128, %s428_s18, %s2812_s16  }
  0xe2   : > { %436 = sbr.rel (%p2813_p7) target bundleno = 1211 (0x4bb), region = 48  ;;  %s2464_s26 = sand.u32 (!%p2813_p7), 1, %s2065_s25  }
  0xe3   : > { %s2467_s11 = sshll.u32 (!%p2813_p7), %s2464_s26, 4  ;;  %s439_s1 = scalar_lea.sflag (!%p2813_p7), [#allocation6], %s2464_s26 }
  0xe4   : > { %s442_s19 = scalar_lea.vmem (!%p2813_p7), [#allocation5], %s2467_s11  ;;  %p2814_p2 = scmp.ne.s32.totalorder (!%p2813_p7), %s2789_s13, 0 }
  0xe9   : > { %2040 = dma.done.wait (%p2814_p2), %s439_s1, 256  }
  0xea   : > { %2042 = vsyncadd (%p2814_p2), %s439_s1, 4294967040  ;;  %s447_s20 = sand.u32 1, %s2173_s30   ;;  %s451_s22 = scalar_lea.vmem [#allocation8], %s2467_s11 }
  0xeb   : > { %s448_s21 = scalar_lea.sflag [#allocation9], %s447_s20 }
  0xec   : > { %2044 = dma.done.wait (%p2814_p2), %s448_s21, 512  }
  0xed   : > { %2046 = vsyncadd (%p2814_p2), %s448_s21, 4294966784  ;;  %s2482_s17 = sshll.u32 %s2464_s26, 3  ;;  %s2485_s10 = scalar_lea.vmem [#allocation10], %s2467_s11 }
  0xee   : > { %s466_s3 = scalar_lea.sflag [#allocation12], %s447_s20  ;;  %s469_s18 = scalar_lea.vmem [#allocation11], %s2482_s17 }
  0xef   : > { %2048 = dma.done.wait (%p2814_p2), %s466_s3, 256  }
  0xf0   : > { %2050 = vsyncadd (%p2814_p2), %s466_s3, 4294967040  ;;  %s478_s30 = scalar_lea.vmem [#allocation13], %s2482_s17  ;;  %s484_s15 = scalar_lea.sflag [#allocation15], %s447_s20 }
  0xf1   : > { %s487_s9 = scalar_lea.vmem [#allocation14], %s2482_s17 }
  0xf2   : > { %2052 = dma.done.wait (%p2814_p2), %s484_s15, 256  }
  0xf3   : > { %2054 = vsyncadd (%p2814_p2), %s484_s15, 4294967040  ;;  %v1553_v0 = vld [vmem:[%s451_s22] sm:$0xff]   ;;  %vm571_vm0 = vcmask 64512   ;;  %v2093_v6 = vmov 0.0   ;;  %s2094_s13 = smov 4   ;;  %s2095_s12 = smov 124  }
  0xf4   : > { %v1545_v1 = vld [vmem:[%s442_s19] sm:$0xff]   ;;  %v1554_v2 = vunpack.c.l.bf16 %v1553_v0  ;;  %v1555_v3 = vunpack.c.h.bf16 %v1553_v0  ;;  %1578 = vmatprep.subr.bf16.mxu0 %v2093_v6  ;;  %572 = vst.msk [vmem:[#allocation4] sm:$0xff] %vm571_vm0, %v2093_v6  ;;  %573 = vst.msk [vmem:[#allocation4 + $0x8] sm:$0xff] %vm571_vm0, %v2093_v6  ;;  %1584 = vmatprep.subr.bf16.mxu1 %v2093_v6  ;;  %v1561_v11 = vld [vmem:[%s451_s22 + $0x8] sm:$0xff]   ;;  %vm2096_vm1 = vmmov 0   ;;  %vm634_vm2 = vcmask 31744  }
  0xf5   : > { %v2502_v4 = vunpack.c.l.bf16 %v1545_v1  ;;  %v2504_v5 = vunpack.c.h.bf16 %v1545_v1  ;;  %574 = vst.msk [vmem:[#allocation4 + $0x10] sm:$0xff] %vm571_vm0, %v2093_v6  ;;  %575 = vst.msk [vmem:[#allocation4 + $0x18] sm:$0xff] %vm571_vm0, %v2093_v6  ;;  %1580 = vmatprep.mubr.msk.bf16.mxu0 %vm2096_vm1, %v2093_v6  ;;  %1586 = vmatprep.mubr.msk.bf16.mxu1 %vm2096_vm1, %v2093_v6  ;;  %v2530_v14 = vunpack.c.l.bf16 %v1561_v11  ;;  %v2532_v15 = vunpack.c.h.bf16 %v1561_v11  ;;  %v1560_v16 = vld [vmem:[%s442_s19 + $0x8] sm:$0xff]   ;;  %v655_v25 = vld [vmem:[%s487_s9] sm:$0xff]  ;;  %s496_s7 = scalar_lea.vmem [#allocation16], %s2482_s17  ;;  %s2815_s5 = sld [smem:[#allocation25_spill]] }
  0xf6   : > { %v1729_v7 = vpack.i.bf16 %v1555_v3, %v1554_v2  ;;  %v657_v8 = vsub.f32 0.0, %v1554_v2  ;;  %v658_v9 = vsub.f32 0.0, %v1555_v3  ;;  %v2540_v19 = vunpack.c.l.bf16 %v1560_v16  ;;  %v656_v30 = vld [vmem:[%s496_s7] sm:$0xff]  ;;  %v596_v41 = vld [vmem:[%s469_s18] sm:$0xff]  ;;  %s556_s24 = scalar_lea.vmem [#allocation17], %s2467_s11  ;;  %s2816_s8 = sld [smem:[#allocation27_spill]] }
  0xf7   : > { %v1734_v10 = vpack.i.bf16 %v2504_v5, %v2502_v4  ;;  %v599_v12 = vsub.f32 0.0, %v2504_v5  ;;  %v598_v13 = vsub.f32 0.0, %v2502_v4  ;;  %v659_v17 = vsub.f32 0.0, %v2530_v14  ;;  %v597_v43 = vld [vmem:[%s478_s30] sm:$0xff]  ;;  %s1282_s23 = sshll.u32 %s556_s24, 4  ;;  %s2817_s11 = sld [smem:[#allocation33_spill]]  ;;  %s2696_s23 = int_to_ptr.vmem [resolvable:$true] %s1282_s23 }
  0xf8   : > { %1730 = vrot.lane.b32.xlu1 %v1729_v7, %s2094_s13  ;;  %665 = vrot.lane.b32.xlu0 %v657_v8, %s2095_s12  ;;  %v660_v18 = vsub.f32 0.0, %v2532_v15  ;;  %v1739_v20 = vpack.i.bf16 %v2532_v15, %v2530_v14  ;;  %v600_v21 = vsub.f32 0.0, %v2540_v19  ;;  %v2547_v22 = vunpack.c.h.bf16 %v1560_v16  ;;  %s1269_s19 = scalar_lea.sflag [#allocation7], %s2464_s26  ;;  %s1987_s20 = scalar_lea.vmem %s2696_s23, 256 }
  0xf9   : > { %v697_v31 = vmul.f32 %v1554_v2, %v655_v25  ;;  %v698_v36 = vmul.f32 %v1555_v3, %v655_v25  ;;  %v639_v45 = vmul.f32 %v2502_v4, %v596_v41  ;;  %v640_v49 = vmul.f32 %v2504_v5, %v596_v41  ;;  %p1988_p13 = scmp.ne.s32.totalorder %s2696_s23, %s1987_s20  ;;  %s2099_s21 = smov [#allocation17]  }
  0xfa   : > { %v1744_v23 = vpack.i.bf16 %v2547_v22, %v2540_v19  ;;  %v601_v24 = vsub.f32 0.0, %v2547_v22  ;;  %v699_v3 = vmul.f32 %v2530_v14, %v655_v25  ;;  %v700_v4 = vmul.f32 %v2532_v15, %v655_v25  ;;  %s1991_s22 = sshll.u32 %s2099_s21, 4  ;;  %s1992_s22 = int_to_ptr.vmem [resolvable:$false] %s1991_s22 }
  0xfb   : > { %v642_v14 = vmul.f32 %v2547_v22, %v596_v41  ;;  %vm562_vm3 = vcmask 7168   ;;  %vm1026_vm4 = vcmask 1043456   ;;  %vm1263_vm5 = vcmask 60416   ;;  %s1541_s14 = sshll.u32 %s2815_s5, 6  ;;  %s1993_s17 = scalar_lea.vmem %s1992_s22, 512 }
  0xfc   : > { %667 = vrot.lane.b32.xlu0 %v658_v9, %s2095_s12  ;;  %1735 = vrot.lane.b32.xlu1 %v1734_v10, %s2094_s13  ;;  %567 = vst.msk [vmem:[#allocation3] sm:$0xff] %vm562_vm3, %v2093_v6  ;;  %568 = vst.msk [vmem:[#allocation3 + $0x8] sm:$0xff] %vm562_vm3, %v2093_v6  ;;  %p2818_p5 = scmp.ne.s32.totalorder %s2816_s8, 0  ;;  %p1994_p10 = scmp.lt.s32.totalorder %s2696_s23, %s1992_s22 }
  0xfd   : > { %569 = vst.msk [vmem:[#allocation3 + $0x10] sm:$0xff] %vm562_vm3, %v2093_v6  ;;  %570 = vst.msk [vmem:[#allocation3 + $0x18] sm:$0xff] %vm562_vm3, %v2093_v6  ;;  %s2702_s1 = scalar_lea.hbm %s2817_s11, %s1541_s14  ;;  %p1995_p12 = scmp.lt.s32.totalorder %s1993_s17, %s1987_s20 }
  0xfe   : > { %p1989_p9 = pnand %p1988_p13, %p2818_p5 }
  0xff   : > { %p1996_p0 = por %p1995_p12, %p1994_p10 }
 0x100   : > { %608 = vrot.lane.b32.xlu0 %v599_v12, %s2095_s12  ;;  %606 = vrot.lane.b32.xlu1 %v598_v13, %s2095_s12  ;;  %p1990_p4 = pneg %p1989_p9 }
 0x102   : > { %p1997_p1 = pnand %p1996_p0, %p1990_p4 }
 0x104   : > { %669 = vrot.lane.b32.xlu0 %v659_v17, %s2095_s12  ;;  %671 = vrot.lane.b32.xlu1 %v660_v18, %s2095_s12  ;;  %v641_v17 = vmul.f32 %v2540_v19, %v596_v41 }
 0x108   : > { %1740 = vrot.lane.b32.xlu0 %v1739_v20, %s2094_s13  ;;  %610 = vrot.lane.b32.xlu1 %v600_v21, %s2095_s12 }
 0x10c   : > { %1745 = vrot.lane.b32.xlu1 %v1744_v23, %s2094_s13  ;;  %612 = vrot.lane.b32.xlu0 %v601_v24, %s2095_s12 }
 0x16a   : > { %v1731_v26 = vpop.permute.xlu1 %1730  ;;  %v666_v27 = vpop.permute.xlu0 %665 }
 0x16b   : > { %v1733_v28 = vunpack.i.h.bf16 %v1731_v26  ;;  %v1732_v29 = vunpack.i.l.bf16 %v1731_v26 }
 0x16d   : > { %v693_v32 = vsel %vm634_vm2, %v666_v27, %v1732_v29 }
 0x16e   : > { %v701_v33 = vmul.f32 %v693_v32, %v656_v30  ;;  %v668_v34 = vpop.permute.xlu0 %667  ;;  %v1736_v35 = vpop.permute.xlu1 %1735 }
 0x16f   : > { %v694_v37 = vsel %vm634_vm2, %v668_v34, %v1733_v28  ;;  %v1738_v38 = vunpack.i.h.bf16 %v1736_v35  ;;  %v1737_v39 = vunpack.i.l.bf16 %v1736_v35 }
 0x170   : > { %v702_v40 = vmul.f32 %v694_v37, %v656_v30  ;;  %v705_v42 = vadd.f32 %v701_v33, %v697_v31 }
 0x172   : > { %v609_v44 = vpop.permute.xlu0 %608  ;;  %v607_v46 = vpop.permute.xlu1 %606  ;;  %v709_v47 = vpack.c.bf16 %v705_v42, %v705_v42  ;;  %v706_v48 = vadd.f32 %v702_v40, %v698_v36 }
 0x173   : > { %v636_v50 = vsel %vm634_vm2, %v609_v44, %v1738_v38  ;;  %v635_v51 = vsel %vm634_vm2, %v607_v46, %v1737_v39  ;;  %v2098_v46 = vmov 0  }
 0x174   : > { %v644_v52 = vmul.f32 %v636_v50, %v597_v43  ;;  %v643_v53 = vmul.f32 %v635_v51, %v597_v43  ;;  %v718_v54 = vsel %vm571_vm0, %v709_v47, 0  ;;  %v710_v55 = vpack.c.bf16 %v706_v48, %v706_v48  ;;  %1749 = vset.pattern.permute.xlu1 %v2098_v46  ;;  %1750 = vset.pattern.permute.xlu0 %v2098_v46 }
 0x175   : > { %1579 = vmatpush3.bf16.xpose.msra.mxu0 %v718_v54 }
 0x176   : > { %v647_v56 = vadd.f32 %v643_v53, %v639_v45  ;;  %v670_v57 = vpop.permute.xlu0 %669  ;;  %v672_v58 = vpop.permute.xlu1 %671  ;;  %v764_v59 = vsel %vm571_vm0, %v710_v55, 0  ;;  %1590 = vmatprep.subr.bf16.mxu0 %v2093_v6  ;;  %v648_v60 = vadd.f32 %v644_v52, %v640_v49 }
 0x177   : > { %1585 = vmatpush3.bf16.xpose.msra.mxu1 %v764_v59 }
 0x178   : > { %v651_v61 = vpack.c.bf16 %v647_v56, %v647_v56  ;;  %1596 = vmatprep.subr.bf16.mxu1 %v2093_v6  ;;  %v652_v2 = vpack.c.bf16 %v648_v60, %v648_v60  ;;  %v592_v60 = vld [vmem:[%s2485_s10] sm:$0xf] }
 0x17a   : > { %v1741_v62 = vpop.permute.xlu0 %1740  ;;  %v611_v63 = vpop.permute.xlu1 %610 }
 0x17b   : > { %v1743_v0 = vunpack.i.h.bf16 %v1741_v62  ;;  %v1742_v1 = vunpack.i.l.bf16 %v1741_v62 }
 0x17c   : > { %1581 = vmatmul.mubr.msk.bf16.vlgmr.msra.gmra.mrb[0].mxu0 %vm571_vm0, %v651_v61  ;;  %v1028_v61 = vsel %vm1026_vm4, %v592_v60, 0 }
 0x17d   : > { %v695_v5 = vsel %vm634_vm2, %v670_v57, %v1742_v1  ;;  %v696_v7 = vsel %vm634_vm2, %v672_v58, %v1743_v0  ;;  %1592 = vmatprep.mubr.msk.bf16.mxu0 %vm2096_vm1, %v2093_v6  ;;  %v593_v1 = vld [vmem:[%s2485_s10 + $0x4] sm:$0xf] }
 0x17e   : > { %v703_v8 = vmul.f32 %v695_v5, %v656_v30  ;;  %v704_v9 = vmul.f32 %v696_v7, %v656_v30  ;;  %1587 = vmatmul.mubr.msk.bf16.vlgmr.msra.gmra.mrb[0].mxu1 %vm571_vm0, %v652_v2  ;;  %v1746_v10 = vpop.permute.xlu1 %1745  ;;  %v613_v11 = vpop.permute.xlu0 %612  ;;  %v2097_v30 = vmov -inf  }
 0x17f   : > { %v1748_v12 = vunpack.i.h.bf16 %v1746_v10  ;;  %v1747_v13 = vunpack.i.l.bf16 %v1746_v10  ;;  %1598 = vmatprep.mubr.msk.bf16.mxu1 %vm2096_vm1, %v2093_v6  ;;  %563 = vst.msk [vmem:[#allocation2] sm:$0xff] %vm562_vm3, %v2097_v30  ;;  %564 = vst.msk [vmem:[#allocation2 + $0x8] sm:$0xff] %vm562_vm3, %v2097_v30 }
 0x180   : > { %v707_v15 = vadd.f32 %v703_v8, %v699_v3  ;;  %v708_v16 = vadd.f32 %v704_v9, %v700_v4  ;;  %565 = vst.msk [vmem:[#allocation2 + $0x10] sm:$0xff] %vm562_vm3, %v2097_v30  ;;  %566 = vst.msk [vmem:[#allocation2 + $0x18] sm:$0xff] %vm562_vm3, %v2097_v30  ;;  %v1074_v3 = vsel %vm1026_vm4, %v593_v1, 0 }
 0x181   : > { %v637_v18 = vsel %vm634_vm2, %v611_v63, %v1747_v13  ;;  %v638_v20 = vsel %vm634_vm2, %v613_v11, %v1748_v12 }
 0x182   : > { %v645_v21 = vmul.f32 %v637_v18, %v597_v43  ;;  %v646_v23 = vmul.f32 %v638_v20, %v597_v43  ;;  %v711_v24 = vpack.c.bf16 %v707_v15, %v707_v15  ;;  %v712_v25 = vpack.c.bf16 %v708_v16, %v708_v16  ;;  %v594_v15 = vld [vmem:[%s2485_s10 + $0x8] sm:$0xf] }
 0x184   : > { %v650_v26 = vadd.f32 %v646_v23, %v642_v14  ;;  %v810_v27 = vsel %vm571_vm0, %v711_v24, 0  ;;  %v856_v28 = vsel %vm571_vm0, %v712_v25, 0  ;;  %v649_v22 = vadd.f32 %v645_v21, %v641_v17  ;;  %v595_v17 = vld [vmem:[%s2485_s10 + $0xc] sm:$0xf] }
 0x185   : > { %1591 = vmatpush3.bf16.xpose.msra.mxu0 %v810_v27  ;;  %1597 = vmatpush3.bf16.xpose.msra.mxu1 %v856_v28  ;;  %v1120_v23 = vsel %vm1026_vm4, %v594_v15, 0  ;;  %v1166_v28 = vsel %vm1026_vm4, %v595_v17, 0 }
 0x186   : > { %1602 = vmatprep.subr.bf16.mxu0 %v2093_v6  ;;  %1608 = vmatprep.subr.bf16.mxu1 %v2093_v6  ;;  %v654_v19 = vpack.c.bf16 %v650_v26, %v650_v26  ;;  %v653_v29 = vpack.c.bf16 %v649_v22, %v649_v22  ;;  %v2625_v52 = vld [vmem:[#allocation2] sm:$0xff]  ;;  %v2627_v54 = vld [vmem:[#allocation2 + $0x8] sm:$0xff] }
 0x187   : > { %v2643_v62 = vld [vmem:[#allocation2 + $0x10] sm:$0xff]  ;;  %v2649_v2 = vld [vmem:[#allocation2 + $0x18] sm:$0xff] }
 0x18c   : > { %1593 = vmatmul.mubr.msk.bf16.vlgmr.msra.gmra.mrb[4].mxu0 %vm571_vm0, %v653_v29  ;;  %1599 = vmatmul.mubr.msk.bf16.vlgmr.msra.gmra.mrb[4].mxu1 %vm571_vm0, %v654_v19 }
 0x18d   : > { %1604 = vmatprep.mubr.msk.bf16.mxu0 %vm2096_vm1, %v2093_v6  ;;  %1610 = vmatprep.mubr.msk.bf16.mxu1 %vm2096_vm1, %v2093_v6 }
 0x18e   : > { %1603 = vmatpush3.bf16.msra.mxu0 %v1028_v61  ;;  %1609 = vmatpush3.bf16.msra.mxu1 %v1074_v3 }
 0x18f   : > { %1614 = vmatprep.subr.bf16.mxu0 %v2093_v6  ;;  %1620 = vmatprep.subr.bf16.mxu1 %v2093_v6 }
 0x24f   : > { %v2609_v31 = vpop.f32.mrb[0].mxu0 }
 0x250   : > { %v1582_v32 = vpop.f32.mrb[1].mxu0  ;;  %v902_v33 = vsel %vm571_vm0, %v2609_v31, -inf }
 0x251   : > { %v2613_v34 = vpop.f32.mrb[0].mxu1  ;;  %903 = vmax.xlane.f32.xlu0 %v902_v33  ;;  %v757_v35 = vpop.f32.mrb[2].mxu0 }
 0x252   : > { %v1583_v36 = vpop.f32.mrb[3].mxu0  ;;  %v1588_v37 = vpop.f32.mrb[1].mxu1  ;;  %v905_v38 = vsel %vm571_vm0, %v2613_v34, -inf }
 0x253   : > { %v803_v39 = vpop.f32.mrb[2].mxu1  ;;  %906 = vmax.xlane.f32.xlu1 %v905_v38 }
 0x254   : > { %v1589_v40 = vpop.f32.mrb[3].mxu1 }
 0x25f   : > { %v2617_v41 = vpop.f32.mrb[4].mxu0  ;;  %v2619_v42 = vpop.f32.mrb[4].mxu1 }
 0x260   : > { %v1594_v43 = vpop.f32.mrb[5].mxu0  ;;  %v1600_v44 = vpop.f32.mrb[5].mxu1  ;;  %v908_v45 = vsel %vm571_vm0, %v2617_v41, -inf  ;;  %v911_v51 = vsel %vm571_vm0, %v2619_v42, -inf }
 0x261   : > { %v895_v47 = vpop.f32.mrb[6].mxu1  ;;  %909 = vmax.xlane.f32.xlu0 %v908_v45  ;;  %v849_v48 = vpop.f32.mrb[6].mxu0  ;;  %v962_v44 = vld [vmem:[#allocation3] sm:$0xff]  ;;  %v963_v45 = vld [vmem:[#allocation3 + $0x8] sm:$0xff] }
 0x262   : > { %v1595_v49 = vpop.f32.mrb[7].mxu0  ;;  %v1601_v50 = vpop.f32.mrb[7].mxu1 }
 0x265   : > { %912 = vmax.xlane.f32.xlu0 %v911_v51 }
 0x2de   : > { %v904_v53 = vpop.xlane.xlu0 %903 }
 0x2df   : > { %v2630_v55 = vmax.f32 %v2625_v52, %v904_v53  ;;  %v964_v53 = vld [vmem:[#allocation3 + $0x10] sm:$0xff] }
 0x2e0   : > { %v907_v56 = vpop.xlane.xlu1 %906 }
 0x2e1   : > { %v918_v57 = vsub.f32 %v2625_v52, %v2630_v55  ;;  %1216 = vst.msk [vmem:[#allocation2] sm:$0xff] %vm562_vm3, %v2630_v55  ;;  %v915_v58 = vmax.f32 %v2627_v54, %v907_v56  ;;  %932 = vperm.xlu1 %1749, %v2630_v55  }
 0x2e3   : > { %v919_v59 = vsub.f32 %v2627_v54, %v915_v58  ;;  %1217 = vst.msk [vmem:[#allocation2 + $0x8] sm:$0xff] %vm562_vm3, %v915_v58  ;;  %937 = vperm.xlu0 %1750, %v915_v58  }
 0x2ee   : > { %v910_v63 = vpop.xlane.xlu0 %909 }
 0x2ef   : > { %v2646_v0 = vmax.f32 %v2643_v62, %v910_v63 }
 0x2f1   : > { %v920_v4 = vsub.f32 %v2643_v62, %v2646_v0  ;;  %1218 = vst.msk [vmem:[#allocation2 + $0x10] sm:$0xff] %vm562_vm3, %v2646_v0  ;;  %942 = vperm.xlu1 %1749, %v2646_v0  }
 0x2f2   : > { %v913_v5 = vpop.xlane.xlu0 %912 }
 0x2f3   : > { %v917_v7 = vmax.f32 %v2649_v2, %v913_v5  ;;  %v926_v39 = vmul.f32 1.442695, %v920_v4  ;;  %v991_v4 = vld [vmem:[#allocation4] sm:$0xff] }
 0x2f5   : > { %v921_v8 = vsub.f32 %v2649_v2, %v917_v7  ;;  %1219 = vst.msk [vmem:[#allocation2 + $0x18] sm:$0xff] %vm562_vm3, %v917_v7  ;;  %947 = vperm.xlu1 %1749, %v917_v7   ;;  %v992_v7 = vld [vmem:[#allocation4 + $0x8] sm:$0xff] }
 0x2f7   : > { %v928_v40 = vmul.f32 1.442695, %v921_v8 }
 0x360   : > { %v933_v9 = vpop.permute.xlu1 %932 }
 0x361   : > { %v950_v10 = vsub.f32 %v2609_v31, %v933_v9  ;;  %v924_v31 = vmul.f32 1.442695, %v919_v59 }
 0x362   : > { %v938_v11 = vpop.permute.xlu0 %937 }
 0x363   : > { %v954_v12 = vmul.f32 1.442695, %v950_v10  ;;  %v951_v13 = vsub.f32 %v2613_v34, %v938_v11 }
 0x365   : > { %1751 = vpow2.f32 %v954_v12  ;;  %v956_v14 = vmul.f32 1.442695, %v951_v13 }
 0x367   : > { %1753 = vpow2.f32 %v956_v14 }
 0x36f   : > { %v1752_v16 = vpop.eup %1751 }
 0x370   : > { %v943_v18 = vpop.permute.xlu1 %942  ;;  %v970_v20 = vsel %vm571_vm0, %v1752_v16, 0.0  ;;  %v1019_v21 = vpack.c.bf16 %v1752_v16, %v1752_v16 }
 0x371   : > { %v1754_v24 = vpop.eup %1753  ;;  %v952_v25 = vsub.f32 %v2617_v41, %v943_v18  ;;  %971 = vadd.xlane.f32.xlu1 %v970_v20 }
 0x372   : > { %1605 = vmatmul.mubr.msk.bf16.vlgmr.msra.gmra.mrb[8].mxu0 %vm571_vm0, %v1019_v21  ;;  %v973_v26 = vsel %vm571_vm0, %v1754_v24, 0.0  ;;  %v1020_v27 = vpack.c.bf16 %v1754_v24, %v1754_v24  ;;  %v993_v24 = vld [vmem:[#allocation4 + $0x10] sm:$0xff] }
 0x373   : > { %v958_v22 = vmul.f32 1.442695, %v952_v25  ;;  %974 = vadd.xlane.f32.xlu0 %v973_v26  ;;  %1615 = vmatpush3.bf16.msra.mxu0 %v1120_v23  ;;  %v994_v26 = vld [vmem:[#allocation4 + $0x18] sm:$0xff] }
 0x374   : > { %1611 = vmatmul.mubr.msk.bf16.vlgmr.msra.gmra.mrb[8].mxu1 %vm571_vm0, %v1020_v27  ;;  %v948_v19 = vpop.permute.xlu1 %947  ;;  %1616 = vmatprep.mubr.msk.bf16.mxu0 %vm2096_vm1, %v2093_v6 }
 0x375   : > { %1755 = vpow2.f32 %v958_v22  ;;  %v953_v29 = vsub.f32 %v2619_v42, %v948_v19  ;;  %1621 = vmatpush3.bf16.msra.mxu1 %v1166_v28  ;;  %1622 = vmatprep.mubr.msk.bf16.mxu1 %vm2096_vm1, %v2093_v6  ;;  %v922_v6 = vmul.f32 1.442695, %v918_v57  ;;  %v965_v57 = vld [vmem:[#allocation3 + $0x18] sm:$0xff] }
 0x377   : > { %v960_v30 = vmul.f32 1.442695, %v953_v29 }
 0x379   : > { %1757 = vpow2.f32 %v960_v30 }
 0x37a   : > { %1759 = vpow2.f32 %v924_v31 }
 0x37b   : > { %1761 = vpow2.f32 %v922_v6 }
 0x37c   : > { %1763 = vpow2.f32 %v926_v39 }
 0x37d   : > { %1765 = vpow2.f32 %v928_v40 }
 0x37f   : > { %v1756_v32 = vpop.eup %1755 }
 0x380   : > { %v976_v33 = vsel %vm571_vm0, %v1756_v32, 0.0  ;;  %v1021_v34 = vpack.c.bf16 %v1756_v32, %v1756_v32 }
 0x381   : > { %977 = vadd.xlane.f32.xlu1 %v976_v33 }
 0x382   : > { %1617 = vmatmul.mubr.msk.bf16.vlgmr.msra.gmra.mrb[12].mxu0 %vm571_vm0, %v1021_v34 }
 0x383   : > { %v1758_v35 = vpop.eup %1757 }
 0x384   : > { %v979_v36 = vsel %vm571_vm0, %v1758_v35, 0.0  ;;  %v1022_v37 = vpack.c.bf16 %v1758_v35, %v1758_v35  ;;  %v1760_v38 = vpop.eup %1759 }
 0x385   : > { %980 = vadd.xlane.f32.xlu1 %v979_v36  ;;  %v1762_v41 = vpop.eup %1761  ;;  %v967_v49 = vmul.f32 %v1760_v38, %v963_v45 }
 0x386   : > { %1623 = vmatmul.mubr.msk.bf16.vlgmr.msra.gmra.mrb[12].mxu1 %vm571_vm0, %v1022_v37  ;;  %v1764_v42 = vpop.eup %1763  ;;  %v966_v46 = vmul.f32 %v1762_v41, %v962_v44 }
 0x387   : > { %v1766_v43 = vpop.eup %1765  ;;  %v968_v55 = vmul.f32 %v1764_v42, %v964_v53 }
 0x388   : > { %v969_v59 = vmul.f32 %v1766_v43, %v965_v57 }
 0x389   : > { %1002 = vperm.xlu0 %1750, %v1760_v38  }
 0x396   : > { %997 = vperm.xlu1 %1749, %v1762_v41  }
 0x39a   : > { %1007 = vperm.xlu1 %1749, %v1764_v42  }
 0x39e   : > { %1012 = vperm.xlu1 %1749, %v1766_v43  }
 0x3fe   : > { %v972_v47 = vpop.xlane.xlu1 %971 }
 0x3ff   : > { %v982_v48 = vadd.f32 %v972_v47, %v966_v46 }
 0x400   : > { %v975_v50 = vpop.xlane.xlu0 %974 }
 0x401   : > { %987 = vst.msk [vmem:[#allocation3] sm:$0xff] %vm562_vm3, %v982_v48  ;;  %v983_v51 = vadd.f32 %v975_v50, %v967_v49 }
 0x403   : > { %988 = vst.msk [vmem:[#allocation3 + $0x8] sm:$0xff] %vm562_vm3, %v983_v51 }
 0x408   : > { %v1223_v52 = vld [vmem:[#allocation3] sm:$0xff]  ;;  %v1003_v8 = vpop.permute.xlu0 %1002 }
 0x409   : > { %1767 = vrcp.f32 %v1223_v52  ;;  %v1016_v11 = vmul.f32 %v1003_v8, %v992_v7 }
 0x40a   : > { %v1224_v54 = vld [vmem:[#allocation3 + $0x8] sm:$0xff] }
 0x40b   : > { %1769 = vrcp.f32 %v1224_v54 }
 0x40e   : > { %v978_v56 = vpop.xlane.xlu1 %977 }
 0x40f   : > { %v984_v58 = vadd.f32 %v978_v56, %v968_v55 }
 0x411   : > { %989 = vst.msk [vmem:[#allocation3 + $0x10] sm:$0xff] %vm562_vm3, %v984_v58 }
 0x412   : > { %v981_v60 = vpop.xlane.xlu1 %980 }
 0x413   : > { %v1768_v61 = vpop.eup %1767  ;;  %v985_v62 = vadd.f32 %v981_v60, %v969_v59 }
 0x414   : > { %1237 = vperm.xlu1 %1749, %v1768_v61  }
 0x415   : > { %990 = vst.msk [vmem:[#allocation3 + $0x18] sm:$0xff] %vm562_vm3, %v985_v62  ;;  %v1770_v63 = vpop.eup %1769 }
 0x416   : > { %v998_v5 = vpop.permute.xlu1 %997 }
 0x417   : > { %v1015_v9 = vmul.f32 %v998_v5, %v991_v4 }
 0x418   : > { %1242 = vperm.xlu1 %1749, %v1770_v63   ;;  %v1225_v0 = vld [vmem:[#allocation3 + $0x10] sm:$0xff] }
 0x419   : > { %1771 = vrcp.f32 %v1225_v0 }
 0x41a   : > { %v1008_v23 = vpop.permute.xlu1 %1007 }
 0x41b   : > { %v1017_v25 = vmul.f32 %v1008_v23, %v993_v24 }
 0x41c   : > { %v1226_v1 = vld [vmem:[#allocation3 + $0x18] sm:$0xff] }
 0x41d   : > { %1773 = vrcp.f32 %v1226_v1 }
 0x41e   : > { %v1013_v27 = vpop.permute.xlu1 %1012 }
 0x41f   : > { %v1018_v30 = vmul.f32 %v1013_v27, %v994_v26 }
 0x423   : > { %v1772_v2 = vpop.eup %1771 }
 0x424   : > { %1247 = vperm.xlu0 %1750, %v1772_v2  }
 0x427   : > { %v1774_v3 = vpop.eup %1773 }
 0x428   : > { %1252 = vperm.xlu1 %1749, %v1774_v3  }
 0x445   : > { %v1064_v10 = vpop.f32.mrb[8].mxu0 }
 0x446   : > { %v1208_v12 = vadd.f32 %v1064_v10, %v1015_v9  ;;  %v1606_v13 = vpop.f32.mrb[9].mxu0 }
 0x447   : > { %v1067_v14 = vpop.f32.mrb[10].mxu0  ;;  %v1110_v15 = vpop.f32.mrb[8].mxu1 }
 0x448   : > { %1212 = vst.msk [vmem:[#allocation4] sm:$0xff] %vm571_vm0, %v1208_v12  ;;  %v1209_v16 = vadd.f32 %v1110_v15, %v1016_v11  ;;  %v1607_v17 = vpop.f32.mrb[11].mxu0  ;;  %v1612_v18 = vpop.f32.mrb[9].mxu1 }
 0x449   : > { %v1113_v20 = vpop.f32.mrb[10].mxu1 }
 0x44a   : > { %1213 = vst.msk [vmem:[#allocation4 + $0x8] sm:$0xff] %vm571_vm0, %v1209_v16  ;;  %v1613_v21 = vpop.f32.mrb[11].mxu1 }
 0x44f   : > { %v1231_v37 = vld [vmem:[#allocation4] sm:$0xff] }
 0x451   : > { %v1232_v40 = vld [vmem:[#allocation4 + $0x8] sm:$0xff] }
 0x455   : > { %v1156_v28 = vpop.f32.mrb[12].mxu0 }
 0x456   : > { %v1210_v22 = vadd.f32 %v1156_v28, %v1017_v25  ;;  %v1618_v19 = vpop.f32.mrb[13].mxu0 }
 0x457   : > { %v1159_v29 = vpop.f32.mrb[14].mxu0 }
 0x458   : > { %1214 = vst.msk [vmem:[#allocation4 + $0x10] sm:$0xff] %vm571_vm0, %v1210_v22  ;;  %v1619_v31 = vpop.f32.mrb[15].mxu0 }
 0x459   : > { %v1202_v32 = vpop.f32.mrb[12].mxu1 }
 0x45a   : > { %v1211_v33 = vadd.f32 %v1202_v32, %v1018_v30  ;;  %v1624_v34 = vpop.f32.mrb[13].mxu1 }
 0x45b   : > { %v1205_v35 = vpop.f32.mrb[14].mxu1 }
 0x45c   : > { %1215 = vst.msk [vmem:[#allocation4 + $0x18] sm:$0xff] %vm571_vm0, %v1211_v33  ;;  %v1625_v36 = vpop.f32.mrb[15].mxu1 }
 0x45f   : > { %v1233_v45 = vld [vmem:[#allocation4 + $0x10] sm:$0xff] }
 0x463   : > { %v1234_v48 = vld [vmem:[#allocation4 + $0x18] sm:$0xff] }
 0x493   : > { %v1238_v6 = vpop.permute.xlu1 %1237 }
 0x494   : > { %v1255_v38 = vmul.f32 %v1238_v6, %v1231_v37 }
 0x496   : > { %v1259_v39 = vpack.c.bf16 %v1255_v38, %v1255_v38 }
 0x497   : > { %v1243_v41 = vpop.permute.xlu1 %1242 }
 0x498   : > { %1264 = vst.msk [vmem:[%s556_s24] sm:$0xf] %vm1263_vm5, %v1259_v39  ;;  %v1256_v42 = vmul.f32 %v1243_v41, %v1232_v40 }
 0x49a   : > { %v1260_v43 = vpack.c.bf16 %v1256_v42, %v1256_v42 }
 0x49c   : > { %1265 = vst.msk [vmem:[%s556_s24 + $0x4] sm:$0xf] %vm1263_vm5, %v1260_v43 }
 0x4a3   : > { %v1248_v44 = vpop.permute.xlu0 %1247 }
 0x4a4   : > { %v1257_v46 = vmul.f32 %v1248_v44, %v1233_v45 }
 0x4a6   : > { %v1261_v47 = vpack.c.bf16 %v1257_v46, %v1257_v46 }
 0x4a7   : > { %v1253_v49 = vpop.permute.xlu1 %1252 }
 0x4a8   : > { %1266 = vst.msk [vmem:[%s556_s24 + $0x8] sm:$0xf] %vm1263_vm5, %v1261_v47  ;;  %v1258_v50 = vmul.f32 %v1253_v49, %v1234_v48 }
 0x4aa   : > { %v1262_v51 = vpack.c.bf16 %v1258_v50, %v1258_v50 }
 0x4ac   : > { %1267 = vst.msk [vmem:[%s556_s24 + $0xc] sm:$0xf] %vm1263_vm5, %v1262_v51 }
 0x4ad   : > { %2000 = shalt.err (!%p1997_p1)
}
 0x4ae   : > { %s2001_s10 = scalar_lea.hbm %s2702_s1, 256  ;;  %s2005_s30 = scalar_lea.hbm %s2817_s11, 512 }
 0x4af   : > { %p2002_p3 = scmp.ne.s32.totalorder %s2702_s1, %s2001_s10  ;;  %p2006_p8 = scmp.lt.u32.totalorder %s2702_s1, %s2817_s11 }
 0x4b0   : > { %p2007_p7 = scmp.lt.u32.totalorder %s2005_s30, %s2001_s10  ;;  %p2009_p13 = scmp.lt.u32.totalorder %s2001_s10, %s2702_s1 }
 0x4b1   : > { %p2003_p11 = pnand %p2002_p3, %p2818_p5 }
 0x4b2   : > { %p2008_p2 = por %p2007_p7, %p2006_p8 }
 0x4b3   : > { %p2004_p6 = pneg %p2003_p11 }
 0x4b4   : > { %p2010_p9 = por %p2009_p13, %p2008_p2 }
 0x4b6   : > { %p2011_p4 = pnand %p2010_p9, %p2004_p6 }
 0x4b8   : > { %2014 = shalt.err (!%p2011_p4)
}
 0x4b9   : > { %s2100_s12 = smov 64   ;;  %s2101_s7 = smov 128  }
 0x4ba   : > { %1640 = dma.vmem_to_hbm [thread:$0]  (%p2818_p5), %s2696_s23, 256, %s2702_s1, %s1269_s19, %s2100_s12, %s2101_s7, %s2094_s13  }
 0x4bb PF: > { %s2819_s5 = sld [smem:[#allocation23_spill]]  ;;  %s2820_s24 = sld [smem:[#allocation29_spill]] }
 0x4bc   : > { %p2822_p12 = scmp.ge.s32.totalorder %s2081_s29, 2 }
 0x4c1   : > { %s1297_s14 = sand.u32 1, %s2819_s5   ;;  %p2821_p10 = scmp.ne.s32.totalorder %s2820_s24, 0 }
 0x4c2   : > { %s1298_s27 = scalar_lea.sflag [#allocation7], %s1297_s14 }
 0x4c3   : > { %p1665_p0 = pnand %p2822_p12, %p2821_p10 }
 0x4c5   : > { %2056 = dma.done.wait (!%p1665_p0), %s1298_s27, 256  }
 0x4c6   : > { %2058 = vsyncadd (!%p1665_p0), %s1298_s27, 4294967040  ;;  %s32_s29 = sadd.s32 1, %s2081_s29   ;;  %s2823_s16 = sld [smem:[#allocation24_spill]] }
 0x4c7   : > { %p29_p1 = scmp.ge.s32.totalorder %s32_s29, 4   ;;  %s2824_s26 = sld [smem:[#allocation28_spill]] }
 0x4c8   : > { %s2825_s8 = sld [smem:[#allocation26_spill]]  ;;  %s2826_s24 = smov %s2065_s25 }
 0x4c9   : > { %s2828_s27 = smov %s2077_s28  ;;  %31 = sbr.rel (!%p29_p1) target bundleno = 17 (0x11), region = 173 }
 0x4cc   : > { %s2827_s25 = smov %s2823_s16 }
 0x4ce   : > { %s2829_s28 = smov %s2825_s8 }
 0x4d0   :  { %1303 = vsyncpa [#allocation6], 1 }
 0x4d1   :  { %1305 = vsyncpa [#allocation6 + $0x1], 1 }
 0x4d2   :  { %1306 = vsyncpa [#allocation9], 1 }
 0x4d3   :  { %1308 = vsyncpa [#allocation9 + $0x1], 1 }
 0x4d4   :  { %1309 = vsyncpa [#allocation12], 1 }
 0x4d5   :  { %1311 = vsyncpa [#allocation12 + $0x1], 1 }
 0x4d6   :  { %1312 = vsyncpa [#allocation15], 1 }
 0x4d7   :  { %1314 = vsyncpa [#allocation15 + $0x1], 1 }
 0x4d8   :  { %1315 = vsyncpa [#allocation7], 1 }
 0x4d9   :  { %1317 = vsyncpa [#allocation7 + $0x1], 1 }

</bundles_post_ra>
